<compile_context>
chip_gen: v7x
topology: tpu7x:2x2x1
jax: 0.10.0
libtpu: 0.0.40
codegen_flags: <defaults>
</compile_context>

<pallas_src>
import math
import functools

import jax
import jax.numpy as jnp
from jax import lax
from jax.experimental import pallas as pl
from jax.experimental.pallas import tpu as pltpu


def _round_up(x, m):
    return ((x + m - 1) // m) * m


def _vmem_capacity_bytes(default=64 * 1024 * 1024):
    """Physical VMEM per TensorCore (64 MiB on v7x, 128 MiB on v5e/v6e)."""
    try:
        info = pltpu.get_tpu_info()
        for attr in ("vmem_capacity_bytes", "vmem_bytes", "vmem_capacity"):
            val = getattr(info, attr, None)
            if val:
                return int(val)
    except Exception:
        pass
    return default


def _tile_vmem_bytes(t_blk, b_blk, d, h_pad, x_bytes, w_bytes, out_bytes):
    """Approximate per-grid-step VMEM footprint for the chosen tiling."""
    x_blk = 2 * t_blk * b_blk * d * x_bytes            # double-buffered input
    out_blk = 2 * t_blk * b_blk * h_pad * out_bytes    # double-buffered output
    weights = (d * h_pad + h_pad * h_pad) * w_bytes    # single-buffered consts
    bias = 8 * h_pad * 4                               # (1, H) pads to 8 sublanes
    h0 = b_blk * h_pad * 4                             # single-buffered
    h_scr = b_blk * h_pad * 4                          # carried hidden state
    return x_blk + out_blk + weights + bias + h0 + h_scr


def _rnn_kernel(x_ref, wih_ref, whh_ref, b_ref, h0_ref, out_ref, h_scr,
                *, t_blk, nonlinearity, unroll):
    """One (batch-block, time-block) grid step.

    Per timestep t of the block:
      * the input projection for step t+1 (x[t+1] @ W_ih + b) is computed as
        independent work so the scheduler interleaves its MXU pushes into the
        stall slots of the serial chain below;
      * the serial recurrence h_t = act(h_{t-1} @ W_hh + ih_t) is evaluated
        with f32 accumulation and stored lane-dense into the output block.
    The hidden state is carried across time blocks in `h_scr` (VMEM scratch),
    reset from h_0 at ti == 0 for every batch block.
    """
    ti = pl.program_id(1)  # time-block index (innermost, sequential)

    @pl.when(ti == 0)
    def _():
        h_scr[...] = h0_ref[...]

    act = jnp.tanh if nonlinearity == "tanh" else (lambda v: jnp.maximum(v, 0.0))

    wih = wih_ref[...]            # (D, H_pad)   compute dtype
    whh = whh_ref[...]            # (H_pad, H_pad)
    bias = b_ref[...]             # (1, H_pad)   f32, broadcasts over rows

    def project(t):
        # (b_blk, D) @ (D, H_pad) input projection for timestep t of the block.
        return jnp.dot(x_ref[t], wih, preferred_element_type=jnp.float32) + bias

    def step(t, carry):
        h_prev, ih_t = carry
        # Projection for the NEXT timestep: independent of the serial
        # dot->tanh chain, so its MXU work fills the chain's latency.  The
        # clamp keeps the read in-bounds on the last step (result unused).
        ih_next = project(jnp.minimum(t + 1, t_blk - 1))
        h_t = act(jnp.dot(h_prev.astype(whh.dtype), whh,
                          preferred_element_type=jnp.float32) + ih_t)
        out_ref[t] = h_t.astype(out_ref.dtype)
        return h_t, ih_next

    h_last, _ = lax.fori_loop(0, t_blk, step, (h_scr[...], project(0)),
                              unroll=unroll)
    h_scr[...] = h_last


def simple_rnn_forward(x, w_ih, w_hh, b_ih, b_hh, *, h_0=None,
                       nonlinearity="tanh", compute_dtype=jnp.bfloat16,
                       t_blk=None, b_blk=None, unroll=8):
    """SimpleRNN forward (mask=None path).

    x: (T, B, D).  w_ih: (L, D, H), w_hh: (L, H, H), b_ih/b_hh: (L, 1, H)
    (pre-transposed: y = x @ W + b).  Returns (output (T, B, H), h_T (B, H)).

    Matches the PyTorch module.  Only layer L-1's parameters affect the
    result, so only that layer is evaluated.  Matmul operands use
    `compute_dtype` (bf16 by default, MXU-native); accumulation, bias, the
    nonlinearity and the carried hidden state stay f32.
    """
    T, B, D = x.shape
    L, _, H = w_ih.shape
    out_dtype = x.dtype

    x_bytes = jnp.dtype(compute_dtype).itemsize
    w_bytes = x_bytes
    out_bytes = jnp.dtype(out_dtype).itemsize

    # ---- MXU / lane-dense padding -----------------------------------------
    # H padded to a multiple of 128: full-width MXU passes, unmasked vst.
    # (On v6e/v7x, hidden sizes that are native multiples of 256 fill the
    #  2x256x256 MXU best; padding further than 128 is not forced here.)
    h_pad = _round_up(H, 128)
    b8 = _round_up(B, 8)          # sublane-aligned batch rows

    if b_blk is None:
        if b8 <= 128:
            b_blk = b8
        else:
            # >=2 batch blocks (v7x dual-TensorCore), rows a multiple of 128.
            b_blk = max(128, _round_up(math.ceil(b8 / 2), 128))
    assert b_blk % 8 == 0, "b_blk must be a multiple of 8 (sublane tile)"
    b_pad = _round_up(b8, b_blk)

    # ---- VMEM-budget-aware time block --------------------------------------
    vmem_cap = _vmem_capacity_bytes()
    vmem_limit = max(min(int(vmem_cap * 0.9), 120 * 1024 * 1024),
                     32 * 1024 * 1024)
    tile_budget = int(vmem_limit * 0.7)

    if t_blk is None:
        t_blk = 8
        cap = min(512, _round_up(max(T, 8), 8))
        while (t_blk * 2 <= cap and
               _tile_vmem_bytes(t_blk * 2, b_blk, D, h_pad,
                                x_bytes, w_bytes, out_bytes) <= tile_budget):
            t_blk *= 2
    t_pad = _round_up(T, t_blk)
    unroll = max(1, min(unroll, t_blk))

    # ---- dead-layer elim, bias pre-sum, zero padding, dtype casts ----------
    wih = jnp.pad(w_ih[L - 1], ((0, 0), (0, h_pad - H))).astype(compute_dtype)
    whh = jnp.pad(w_hh[L - 1],
                  ((0, h_pad - H), (0, h_pad - H))).astype(compute_dtype)
    bias = jnp.pad((b_ih[L - 1] + b_hh[L - 1]).reshape(1, H),
                   ((0, 0), (0, h_pad - H))).astype(jnp.float32)
    x_p = jnp.pad(x, ((0, t_pad - T), (0, b_pad - B), (0, 0))).astype(compute_dtype)
    if h_0 is None:
        h0_p = jnp.zeros((b_pad, h_pad), jnp.float32)
    else:
        h0_p = jnp.pad(h_0.astype(jnp.float32),
                       ((0, b_pad - B), (0, h_pad - H)))

    kernel = functools.partial(_rnn_kernel, t_blk=t_blk,
                               nonlinearity=nonlinearity, unroll=unroll)

    grid = (b_pad // b_blk, t_pad // t_blk)   # batch outer (parallel), time inner

    def _call(single_buffer_consts):
        # W_ih / W_hh / bias / h_0 never change across time blocks; single-
        # buffering them saves one full pipeline copy of the weights in VMEM.
        const_mode = pl.Buffered(1) if single_buffer_consts else None

        def const_spec(shape, imap):
            if const_mode is None:
                return pl.BlockSpec(shape, imap)
            return pl.BlockSpec(shape, imap, pipeline_mode=const_mode)

        grid_spec = pltpu.PrefetchScalarGridSpec(
            num_scalar_prefetch=0,
            grid=grid,
            in_specs=[
                pl.BlockSpec((t_blk, b_blk, D), lambda bi, ti: (ti, bi, 0)),
                const_spec((D, h_pad), lambda bi, ti: (0, 0)),        # W_ih[L-1]
                const_spec((h_pad, h_pad), lambda bi, ti: (0, 0)),    # W_hh[L-1]
                const_spec((1, h_pad), lambda bi, ti: (0, 0)),        # b_ih+b_hh
                const_spec((b_blk, h_pad), lambda bi, ti: (bi, 0)),   # h_0 block
            ],
            out_specs=pl.BlockSpec((t_blk, b_blk, h_pad),
                                   lambda bi, ti: (ti, bi, 0)),
            scratch_shapes=[pltpu.VMEM((b_blk, h_pad), jnp.float32)],
        )
        return pl.pallas_call(
            kernel,
            out_shape=jax.ShapeDtypeStruct((t_pad, b_pad, h_pad), out_dtype),
            grid_spec=grid_spec,
            compiler_params=pltpu.CompilerParams(
                # Batch blocks are independent ("parallel"; split across the
                # v7x dual TensorCores).  The time axis is the sequential
                # recurrence: it MUST stay innermost and "arbitrary" for the
                # h_scr carry to be correct.
                dimension_semantics=("parallel", "arbitrary"),
                vmem_limit_bytes=vmem_limit,
            ),
        )(x_p, wih, whh, bias, h0_p)

    try:
        out_full = _call(True)
    except Exception:
        # TODO(synk): pipeline_mode=pl.Buffered(1) rejected on this JAX/libtpu
        # combo; fall back to default double-buffering of the constant blocks.
        out_full = _call(False)

    output = out_full[:T, :B, :H]
    return output, output[-1]     # h_T == output[T-1]; no second output stream


def _reference_forward(x, w_ih, w_hh, b_ih, b_hh, nonlinearity="tanh", h_0=None):
    """Pure-JAX mirror of PyTorch SimpleRNN.forward (mask=None), looping over
    ALL layers exactly like the module."""
    T, B, D = x.shape
    L, _, H = w_ih.shape
    act = jnp.tanh if nonlinearity == "tanh" else (lambda v: jnp.maximum(v, 0.0))
    h_prev = jnp.zeros((B, H), jnp.float32) if h_0 is None else h_0
    outs = []
    for t in range(T):
        h_t = h_prev
        for l in range(L):
            h_t = act(x[t] @ w_ih[l] + h_prev @ w_hh[l] + b_ih[l] + b_hh[l])
        outs.append(h_t)
        h_prev = h_t
    return jnp.stack(outs), h_prev


if __name__ == "__main__":
    key = jax.random.PRNGKey(0)

    def make_params(k, L, D, H):
        k1, k2, k3, k4 = jax.random.split(k, 4)
        s_ih = 1.0 / math.sqrt(D)
        s_hh = 1.0 / math.sqrt(H)
        w_ih = jax.random.uniform(k1, (L, D, H), jnp.float32, -s_ih, s_ih)
        b_ih = jax.random.uniform(k2, (L, 1, H), jnp.float32, -s_ih, s_ih)
        w_hh = jax.random.uniform(k3, (L, H, H), jnp.float32, -s_hh, s_hh)
        b_hh = jax.random.uniform(k4, (L, 1, H), jnp.float32, -s_hh, s_hh)
        return w_ih, w_hh, b_ih, b_hh

    # Config 1: seq=16, batch=8, input=16, hidden=32, layers=2.
    T, B, D, H, L = 16, 8, 16, 32, 2
    kx, kp, knext = jax.random.split(key, 3)
    x = jax.random.normal(kx, (T, B, D), dtype=jnp.float32)
    params = make_params(kp, L, D, H)
    ref_out, ref_hT = _reference_forward(x, *params)

    # f32 path with t_blk=8 -> two time blocks, exercising the hidden-state
    # carry across grid steps.  Tight tolerance.
    out, h_T = simple_rnn_forward(x, *params, compute_dtype=jnp.float32, t_blk=8)
    out = jax.block_until_ready(out)
    h_T = jax.block_until_ready(h_T)
    assert out.shape == (T, B, H) and h_T.shape == (B, H)
    assert jnp.allclose(out, ref_out, atol=1e-5, rtol=1e-5)
    assert jnp.allclose(h_T, ref_hT, atol=1e-5, rtol=1e-5)

    # Default path: bf16 MXU operands, f32 accumulation + f32 carried state,
    # auto tiling.  Loose tolerance (bf16 operand rounding through tanh).
    out_bf, h_T_bf = simple_rnn_forward(x, *params)
    out_bf = jax.block_until_ready(out_bf)
    h_T_bf = jax.block_until_ready(h_T_bf)
    assert jnp.allclose(out_bf, ref_out, atol=1e-1)
    assert jnp.allclose(h_T_bf, ref_hT, atol=1e-1)

    # Config 2: ragged shapes (T=10, B=6, D=24, H=48) exercise the T/B/H
    # zero-padding paths end-to-end.  f32, tight tolerance.
    T2, B2, D2, H2, L2 = 10, 6, 24, 48, 1
    kx2, kp2 = jax.random.split(knext)
    x2 = jax.random.normal(kx2, (T2, B2, D2), dtype=jnp.float32)
    params2 = make_params(kp2, L2, D2, H2)
    ref2_out, ref2_hT = _reference_forward(x2, *params2)
    out2, h2 = simple_rnn_forward(x2, *params2, compute_dtype=jnp.float32)
    out2 = jax.block_until_ready(out2)
    h2 = jax.block_until_ready(h2)
    assert out2.shape == (T2, B2, H2) and h2.shape == (B2, H2)
    assert jnp.allclose(out2, ref2_out, atol=1e-5, rtol=1e-5)
    assert jnp.allclose(h2, ref2_hT, atol=1e-5, rtol=1e-5)

    print("KERNEL_OK")
</pallas_src>

<mosaic_0001>
module attributes {stable_mosaic.version = 11 : i64} {
  func.func @_rnn_kernel(%arg0: i32, %arg1: i32, %arg2: memref<8x8x16xf32, #tpu.memory_space<vmem>>, %arg3: memref<16x128xf32, #tpu.memory_space<vmem>>, %arg4: memref<128x128xf32, #tpu.memory_space<vmem>>, %arg5: memref<1x128xf32, #tpu.memory_space<vmem>>, %arg6: memref<8x128xf32, #tpu.memory_space<vmem>>, %arg7: memref<8x8x128xf32, #tpu.memory_space<vmem>>, %arg8: memref<8x128xf32, #tpu.memory_space<vmem>>) attributes {dimension_semantics = [#tpu.dimension_semantics<parallel>, #tpu.dimension_semantics<arbitrary>], iteration_bounds = array<i64: 1, 2>, scalar_prefetch = 0 : i64, scratch_operands = 1 : i64, tpu.core_type = #tpu.core_type<tc>, window_params = [{transform_indices = @transform_0, window_bounds = array<i64: 8, 8, 16>}, {pipeline_mode = #tpu.pipeline_mode<synchronous>, transform_indices = @transform_1, window_bounds = array<i64: 16, 128>}, {pipeline_mode = #tpu.pipeline_mode<synchronous>, transform_indices = @transform_2, window_bounds = array<i64: 128, 128>}, {pipeline_mode = #tpu.pipeline_mode<synchronous>, transform_indices = @transform_3, window_bounds = array<i64: 1, 128>}, {pipeline_mode = #tpu.pipeline_mode<synchronous>, transform_indices = @transform_4, window_bounds = array<i64: 8, 128>}, {transform_indices = @transform_5, window_bounds = array<i64: 8, 8, 128>}]} {
    %c0_i32 = arith.constant 0 : i32
    %0 = arith.cmpi eq, %arg1, %c0_i32 : i32
    %1 = arith.extui %0 : i1 to i32
    %c0_i32_0 = arith.constant 0 : i32
    %2 = arith.cmpi ne, %1, %c0_i32_0 : i32
    scf.if %2 {
      %c0_78 = arith.constant 0 : index
      %c0_79 = arith.constant 0 : index
      %133 = vector.load %arg6[%c0_78, %c0_79] : memref<8x128xf32, #tpu.memory_space<vmem>>, vector<8x128xf32>
      %c0_80 = arith.constant 0 : index
      %c0_81 = arith.constant 0 : index
      %134 = vector.load %arg8[%c0_80, %c0_81] : memref<8x128xf32, #tpu.memory_space<vmem>>, vector<8x128xf32>
      tpu.vector_store %arg8[%c0_80, %c0_81], %133 {strides = array<i32>} : memref<8x128xf32, #tpu.memory_space<vmem>>, vector<8x128xf32>,
    } else {
    }
    %c0 = arith.constant 0 : index
    %c0_1 = arith.constant 0 : index
    %3 = vector.load %arg3[%c0, %c0_1] : memref<16x128xf32, #tpu.memory_space<vmem>>, vector<16x128xf32>
    %c0_2 = arith.constant 0 : index
    %c0_3 = arith.constant 0 : index
    %4 = vector.load %arg4[%c0_2, %c0_3] : memref<128x128xf32, #tpu.memory_space<vmem>>, vector<128x128xf32>
    %c0_4 = arith.constant 0 : index
    %c0_5 = arith.constant 0 : index
    %5 = vector.load %arg5[%c0_4, %c0_5] : memref<1x128xf32, #tpu.memory_space<vmem>>, vector<1x128xf32>
    %c0_6 = arith.constant 0 : index
    %c0_7 = arith.constant 0 : index
    %6 = vector.load %arg8[%c0_6, %c0_7] : memref<8x128xf32, #tpu.memory_space<vmem>>, vector<8x128xf32>
    %c0_8 = arith.constant 0 : index
    %c0_9 = arith.constant 0 : index
    %c0_10 = arith.constant 0 : index
    %7 = vector.load %arg2[%c0_8, %c0_9, %c0_10] : memref<8x8x16xf32, #tpu.memory_space<vmem>>, vector<1x8x16xf32>
    %8 = vector.shape_cast %7 : vector<1x8x16xf32> to vector<8x16xf32>
    %cst = arith.constant dense<0.000000e+00> : vector<8x128xf32>
    %9 = tpu.matmul %8, %3, %cst {dimension_numbers = #tpu.dot_dimension_numbers<[1], [0], [0], [1], [0, 0, 1, 1], [], []>} : vector<8x16xf32>, vector<16x128xf32>, vector<8x128xf32> -> vector<8x128xf32>
    %10 = vector.broadcast %5 : vector<1x128xf32> to vector<8x128xf32>
    %11 = arith.addf %9, %10 : vector<8x128xf32>
    %c0_i32_11 = arith.constant 0 : i32
    %c1_i32 = arith.constant 1 : i32
    %12 = arith.addi %c0_i32_11, %c1_i32 : i32
    %c7_i32 = arith.constant 7 : i32
    %13 = arith.minsi %12, %c7_i32 : i32
    %14 = arith.index_cast %13 : i32 to index
    %c0_12 = arith.constant 0 : index
    %c0_13 = arith.constant 0 : index
    %15 = vector.load %arg2[%14, %c0_12, %c0_13] : memref<8x8x16xf32, #tpu.memory_space<vmem>>, vector<1x8x16xf32>
    %16 = vector.shape_cast %15 : vector<1x8x16xf32> to vector<8x16xf32>
    %cst_14 = arith.constant dense<0.000000e+00> : vector<8x128xf32>
    %17 = tpu.matmul %16, %3, %cst_14 {dimension_numbers = #tpu.dot_dimension_numbers<[1], [0], [0], [1], [0, 0, 1, 1], [], []>} : vector<8x16xf32>, vector<16x128xf32>, vector<8x128xf32> -> vector<8x128xf32>
    %18 = vector.broadcast %5 : vector<1x128xf32> to vector<8x128xf32>
    %19 = arith.addf %17, %18 : vector<8x128xf32>
    %cst_15 = arith.constant dense<0.000000e+00> : vector<8x128xf32>
    %20 = tpu.matmul %6, %4, %cst_15 {dimension_numbers = #tpu.dot_dimension_numbers<[1], [0], [0], [1], [0, 0, 1, 1], [], []>} : vector<8x128xf32>, vector<128x128xf32>, vector<8x128xf32> -> vector<8x128xf32>
    %21 = arith.addf %20, %11 : vector<8x128xf32>
    %22 = math.tanh %21 : vector<8x128xf32>
    %23 = arith.index_cast %c0_i32_11 : i32 to index
    %c0_16 = arith.constant 0 : index
    %c0_17 = arith.constant 0 : index
    %24 = vector.load %arg7[%23, %c0_16, %c0_17] : memref<8x8x128xf32, #tpu.memory_space<vmem>>, vector<1x8x128xf32>
    %25 = vector.shape_cast %24 : vector<1x8x128xf32> to vector<8x128xf32>
    %26 = vector.shape_cast %22 : vector<8x128xf32> to vector<1x8x128xf32>
    tpu.vector_store %arg7[%23, %c0_16, %c0_17], %26 {strides = array<i32>} : memref<8x8x128xf32, #tpu.memory_space<vmem>>, vector<1x8x128xf32>,
    %c1_i32_18 = arith.constant 1 : i32
    %c1_i32_19 = arith.constant 1 : i32
    %27 = arith.addi %c1_i32_18, %c1_i32_19 : i32
    %c7_i32_20 = arith.constant 7 : i32
    %28 = arith.minsi %27, %c7_i32_20 : i32
    %29 = arith.index_cast %28 : i32 to index
    %c0_21 = arith.constant 0 : index
    %c0_22 = arith.constant 0 : index
    %30 = vector.load %arg2[%29, %c0_21, %c0_22] : memref<8x8x16xf32, #tpu.memory_space<vmem>>, vector<1x8x16xf32>
    %31 = vector.shape_cast %30 : vector<1x8x16xf32> to vector<8x16xf32>
    %cst_23 = arith.constant dense<0.000000e+00> : vector<8x128xf32>
    %32 = tpu.matmul %31, %3, %cst_23 {dimension_numbers = #tpu.dot_dimension_numbers<[1], [0], [0], [1], [0, 0, 1, 1], [], []>} : vector<8x16xf32>, vector<16x128xf32>, vector<8x128xf32> -> vector<8x128xf32>
    %33 = vector.broadcast %5 : vector<1x128xf32> to vector<8x128xf32>
    %34 = arith.addf %32, %33 : vector<8x128xf32>
    %cst_24 = arith.constant dense<0.000000e+00> : vector<8x128xf32>
    %35 = tpu.matmul %22, %4, %cst_24 {dimension_numbers = #tpu.dot_dimension_numbers<[1], [0], [0], [1], [0, 0, 1, 1], [], []>} : vector<8x128xf32>, vector<128x128xf32>, vector<8x128xf32> -> vector<8x128xf32>
    %36 = arith.addf %35, %19 : vector<8x128xf32>
    %37 = math.tanh %36 : vector<8x128xf32>
    %38 = arith.index_cast %c1_i32_18 : i32 to index
    %c0_25 = arith.constant 0 : index
    %c0_26 = arith.constant 0 : index
    %39 = vector.load %arg7[%38, %c0_25, %c0_26] : memref<8x8x128xf32, #tpu.memory_space<vmem>>, vector<1x8x128xf32>
    %40 = vector.shape_cast %39 : vector<1x8x128xf32> to vector<8x128xf32>
    %41 = vector.shape_cast %37 : vector<8x128xf32> to vector<1x8x128xf32>
    tpu.vector_store %arg7[%38, %c0_25, %c0_26], %41 {strides = array<i32>} : memref<8x8x128xf32, #tpu.memory_space<vmem>>, vector<1x8x128xf32>,
    %c2_i32 = arith.constant 2 : i32
    %c1_i32_27 = arith.constant 1 : i32
    %42 = arith.addi %c2_i32, %c1_i32_27 : i32
    %c7_i32_28 = arith.constant 7 : i32
    %43 = arith.minsi %42, %c7_i32_28 : i32
    %44 = arith.index_cast %43 : i32 to index
    %c0_29 = arith.constant 0 : index
    %c0_30 = arith.constant 0 : index
    %45 = vector.load %arg2[%44, %c0_29, %c0_30] : memref<8x8x16xf32, #tpu.memory_space<vmem>>, vector<1x8x16xf32>
    %46 = vector.shape_cast %45 : vector<1x8x16xf32> to vector<8x16xf32>
    %cst_31 = arith.constant dense<0.000000e+00> : vector<8x128xf32>
    %47 = tpu.matmul %46, %3, %cst_31 {dimension_numbers = #tpu.dot_dimension_numbers<[1], [0], [0], [1], [0, 0, 1, 1], [], []>} : vector<8x16xf32>, vector<16x128xf32>, vector<8x128xf32> -> vector<8x128xf32>
    %48 = vector.broadcast %5 : vector<1x128xf32> to vector<8x128xf32>
    %49 = arith.addf %47, %48 : vector<8x128xf32>
    %cst_32 = arith.constant dense<0.000000e+00> : vector<8x128xf32>
    %50 = tpu.matmul %37, %4, %cst_32 {dimension_numbers = #tpu.dot_dimension_numbers<[1], [0], [0], [1], [0, 0, 1, 1], [], []>} : vector<8x128xf32>, vector<128x128xf32>, vector<8x128xf32> -> vector<8x128xf32>
    %51 = arith.addf %50, %34 : vector<8x128xf32>
    %52 = math.tanh %51 : vector<8x128xf32>
    %53 = arith.index_cast %c2_i32 : i32 to index
    %c0_33 = arith.constant 0 : index
    %c0_34 = arith.constant 0 : index
    %54 = vector.load %arg7[%53, %c0_33, %c0_34] : memref<8x8x128xf32, #tpu.memory_space<vmem>>, vector<1x8x128xf32>
    %55 = vector.shape_cast %54 : vector<1x8x128xf32> to vector<8x128xf32>
    %56 = vector.shape_cast %52 : vector<8x128xf32> to vector<1x8x128xf32>
    tpu.vector_store %arg7[%53, %c0_33, %c0_34], %56 {strides = array<i32>} : memref<8x8x128xf32, #tpu.memory_space<vmem>>, vector<1x8x128xf32>,
    %c3_i32 = arith.constant 3 : i32
    %c1_i32_35 = arith.constant 1 : i32
    %57 = arith.addi %c3_i32, %c1_i32_35 : i32
    %c7_i32_36 = arith.constant 7 : i32
    %58 = arith.minsi %57, %c7_i32_36 : i32
    %59 = arith.index_cast %58 : i32 to index
    %c0_37 = arith.constant 0 : index
    %c0_38 = arith.constant 0 : index
    %60 = vector.load %arg2[%59, %c0_37, %c0_38] : memref<8x8x16xf32, #tpu.memory_space<vmem>>, vector<1x8x16xf32>
    %61 = vector.shape_cast %60 : vector<1x8x16xf32> to vector<8x16xf32>
    %cst_39 = arith.constant dense<0.000000e+00> : vector<8x128xf32>
    %62 = tpu.matmul %61, %3, %cst_39 {dimension_numbers = #tpu.dot_dimension_numbers<[1], [0], [0], [1], [0, 0, 1, 1], [], []>} : vector<8x16xf32>, vector<16x128xf32>, vector<8x128xf32> -> vector<8x128xf32>
    %63 = vector.broadcast %5 : vector<1x128xf32> to vector<8x128xf32>
    %64 = arith.addf %62, %63 : vector<8x128xf32>
    %cst_40 = arith.constant dense<0.000000e+00> : vector<8x128xf32>
    %65 = tpu.matmul %52, %4, %cst_40 {dimension_numbers = #tpu.dot_dimension_numbers<[1], [0], [0], [1], [0, 0, 1, 1], [], []>} : vector<8x128xf32>, vector<128x128xf32>, vector<8x128xf32> -> vector<8x128xf32>
    %66 = arith.addf %65, %49 : vector<8x128xf32>
    %67 = math.tanh %66 : vector<8x128xf32>
    %68 = arith.index_cast %c3_i32 : i32 to index
    %c0_41 = arith.constant 0 : index
    %c0_42 = arith.constant 0 : index
    %69 = vector.load %arg7[%68, %c0_41, %c0_42] : memref<8x8x128xf32, #tpu.memory_space<vmem>>, vector<1x8x128xf32>
    %70 = vector.shape_cast %69 : vector<1x8x128xf32> to vector<8x128xf32>
    %71 = vector.shape_cast %67 : vector<8x128xf32> to vector<1x8x128xf32>
    tpu.vector_store %arg7[%68, %c0_41, %c0_42], %71 {strides = array<i32>} : memref<8x8x128xf32, #tpu.memory_space<vmem>>, vector<1x8x128xf32>,
    %c4_i32 = arith.constant 4 : i32
    %c1_i32_43 = arith.constant 1 : i32
    %72 = arith.addi %c4_i32, %c1_i32_43 : i32
    %c7_i32_44 = arith.constant 7 : i32
    %73 = arith.minsi %72, %c7_i32_44 : i32
    %74 = arith.index_cast %73 : i32 to index
    %c0_45 = arith.constant 0 : index
    %c0_46 = arith.constant 0 : index
    %75 = vector.load %arg2[%74, %c0_45, %c0_46] : memref<8x8x16xf32, #tpu.memory_space<vmem>>, vector<1x8x16xf32>
    %76 = vector.shape_cast %75 : vector<1x8x16xf32> to vector<8x16xf32>
    %cst_47 = arith.constant dense<0.000000e+00> : vector<8x128xf32>
    %77 = tpu.matmul %76, %3, %cst_47 {dimension_numbers = #tpu.dot_dimension_numbers<[1], [0], [0], [1], [0, 0, 1, 1], [], []>} : vector<8x16xf32>, vector<16x128xf32>, vector<8x128xf32> -> vector<8x128xf32>
    %78 = vector.broadcast %5 : vector<1x128xf32> to vector<8x128xf32>
    %79 = arith.addf %77, %78 : vector<8x128xf32>
    %cst_48 = arith.constant dense<0.000000e+00> : vector<8x128xf32>
    %80 = tpu.matmul %67, %4, %cst_48 {dimension_numbers = #tpu.dot_dimension_numbers<[1], [0], [0], [1], [0, 0, 1, 1], [], []>} : vector<8x128xf32>, vector<128x128xf32>, vector<8x128xf32> -> vector<8x128xf32>
    %81 = arith.addf %80, %64 : vector<8x128xf32>
    %82 = math.tanh %81 : vector<8x128xf32>
    %83 = arith.index_cast %c4_i32 : i32 to index
    %c0_49 = arith.constant 0 : index
    %c0_50 = arith.constant 0 : index
    %84 = vector.load %arg7[%83, %c0_49, %c0_50] : memref<8x8x128xf32, #tpu.memory_space<vmem>>, vector<1x8x128xf32>
    %85 = vector.shape_cast %84 : vector<1x8x128xf32> to vector<8x128xf32>
    %86 = vector.shape_cast %82 : vector<8x128xf32> to vector<1x8x128xf32>
    tpu.vector_store %arg7[%83, %c0_49, %c0_50], %86 {strides = array<i32>} : memref<8x8x128xf32, #tpu.memory_space<vmem>>, vector<1x8x128xf32>,
    %c5_i32 = arith.constant 5 : i32
    %c1_i32_51 = arith.constant 1 : i32
    %87 = arith.addi %c5_i32, %c1_i32_51 : i32
    %c7_i32_52 = arith.constant 7 : i32
    %88 = arith.minsi %87, %c7_i32_52 : i32
    %89 = arith.index_cast %88 : i32 to index
    %c0_53 = arith.constant 0 : index
    %c0_54 = arith.constant 0 : index
    %90 = vector.load %arg2[%89, %c0_53, %c0_54] : memref<8x8x16xf32, #tpu.memory_space<vmem>>, vector<1x8x16xf32>
    %91 = vector.shape_cast %90 : vector<1x8x16xf32> to vector<8x16xf32>
    %cst_55 = arith.constant dense<0.000000e+00> : vector<8x128xf32>
    %92 = tpu.matmul %91, %3, %cst_55 {dimension_numbers = #tpu.dot_dimension_numbers<[1], [0], [0], [1], [0, 0, 1, 1], [], []>} : vector<8x16xf32>, vector<16x128xf32>, vector<8x128xf32> -> vector<8x128xf32>
    %93 = vector.broadcast %5 : vector<1x128xf32> to vector<8x128xf32>
    %94 = arith.addf %92, %93 : vector<8x128xf32>
    %cst_56 = arith.constant dense<0.000000e+00> : vector<8x128xf32>
    %95 = tpu.matmul %82, %4, %cst_56 {dimension_numbers = #tpu.dot_dimension_numbers<[1], [0], [0], [1], [0, 0, 1, 1], [], []>} : vector<8x128xf32>, vector<128x128xf32>, vector<8x128xf32> -> vector<8x128xf32>
    %96 = arith.addf %95, %79 : vector<8x128xf32>
    %97 = math.tanh %96 : vector<8x128xf32>
    %98 = arith.index_cast %c5_i32 : i32 to index
    %c0_57 = arith.constant 0 : index
    %c0_58 = arith.constant 0 : index
    %99 = vector.load %arg7[%98, %c0_57, %c0_58] : memref<8x8x128xf32, #tpu.memory_space<vmem>>, vector<1x8x128xf32>
    %100 = vector.shape_cast %99 : vector<1x8x128xf32> to vector<8x128xf32>
    %101 = vector.shape_cast %97 : vector<8x128xf32> to vector<1x8x128xf32>
    tpu.vector_store %arg7[%98, %c0_57, %c0_58], %101 {strides = array<i32>} : memref<8x8x128xf32, #tpu.memory_space<vmem>>, vector<1x8x128xf32>,
    %c6_i32 = arith.constant 6 : i32
    %c1_i32_59 = arith.constant 1 : i32
    %102 = arith.addi %c6_i32, %c1_i32_59 : i32
    %c7_i32_60 = arith.constant 7 : i32
    %103 = arith.minsi %102, %c7_i32_60 : i32
    %104 = arith.index_cast %103 : i32 to index
    %c0_61 = arith.constant 0 : index
    %c0_62 = arith.constant 0 : index
    %105 = vector.load %arg2[%104, %c0_61, %c0_62] : memref<8x8x16xf32, #tpu.memory_space<vmem>>, vector<1x8x16xf32>
    %106 = vector.shape_cast %105 : vector<1x8x16xf32> to vector<8x16xf32>
    %cst_63 = arith.constant dense<0.000000e+00> : vector<8x128xf32>
    %107 = tpu.matmul %106, %3, %cst_63 {dimension_numbers = #tpu.dot_dimension_numbers<[1], [0], [0], [1], [0, 0, 1, 1], [], []>} : vector<8x16xf32>, vector<16x128xf32>, vector<8x128xf32> -> vector<8x128xf32>
    %108 = vector.broadcast %5 : vector<1x128xf32> to vector<8x128xf32>
    %109 = arith.addf %107, %108 : vector<8x128xf32>
    %cst_64 = arith.constant dense<0.000000e+00> : vector<8x128xf32>
    %110 = tpu.matmul %97, %4, %cst_64 {dimension_numbers = #tpu.dot_dimension_numbers<[1], [0], [0], [1], [0, 0, 1, 1], [], []>} : vector<8x128xf32>, vector<128x128xf32>, vector<8x128xf32> -> vector<8x128xf32>
    %111 = arith.addf %110, %94 : vector<8x128xf32>
    %112 = math.tanh %111 : vector<8x128xf32>
    %113 = arith.index_cast %c6_i32 : i32 to index
    %c0_65 = arith.constant 0 : index
    %c0_66 = arith.constant 0 : index
    %114 = vector.load %arg7[%113, %c0_65, %c0_66] : memref<8x8x128xf32, #tpu.memory_space<vmem>>, vector<1x8x128xf32>
    %115 = vector.shape_cast %114 : vector<1x8x128xf32> to vector<8x128xf32>
    %116 = vector.shape_cast %112 : vector<8x128xf32> to vector<1x8x128xf32>
    tpu.vector_store %arg7[%113, %c0_65, %c0_66], %116 {strides = array<i32>} : memref<8x8x128xf32, #tpu.memory_space<vmem>>, vector<1x8x128xf32>,
    %c7_i32_67 = arith.constant 7 : i32
    %c1_i32_68 = arith.constant 1 : i32
    %117 = arith.addi %c7_i32_67, %c1_i32_68 : i32
    %c7_i32_69 = arith.constant 7 : i32
    %118 = arith.minsi %117, %c7_i32_69 : i32
    %119 = arith.index_cast %118 : i32 to index
    %c0_70 = arith.constant 0 : index
    %c0_71 = arith.constant 0 : index
    %120 = vector.load %arg2[%119, %c0_70, %c0_71] : memref<8x8x16xf32, #tpu.memory_space<vmem>>, vector<1x8x16xf32>
    %121 = vector.shape_cast %120 : vector<1x8x16xf32> to vector<8x16xf32>
    %cst_72 = arith.constant dense<0.000000e+00> : vector<8x128xf32>
    %122 = tpu.matmul %121, %3, %cst_72 {dimension_numbers = #tpu.dot_dimension_numbers<[1], [0], [0], [1], [0, 0, 1, 1], [], []>} : vector<8x16xf32>, vector<16x128xf32>, vector<8x128xf32> -> vector<8x128xf32>
    %123 = vector.broadcast %5 : vector<1x128xf32> to vector<8x128xf32>
    %124 = arith.addf %122, %123 : vector<8x128xf32>
    %cst_73 = arith.constant dense<0.000000e+00> : vector<8x128xf32>
    %125 = tpu.matmul %112, %4, %cst_73 {dimension_numbers = #tpu.dot_dimension_numbers<[1], [0], [0], [1], [0, 0, 1, 1], [], []>} : vector<8x128xf32>, vector<128x128xf32>, vector<8x128xf32> -> vector<8x128xf32>
    %126 = arith.addf %125, %109 : vector<8x128xf32>
    %127 = math.tanh %126 : vector<8x128xf32>
    %128 = arith.index_cast %c7_i32_67 : i32 to index
    %c0_74 = arith.constant 0 : index
    %c0_75 = arith.constant 0 : index
    %129 = vector.load %arg7[%128, %c0_74, %c0_75] : memref<8x8x128xf32, #tpu.memory_space<vmem>>, vector<1x8x128xf32>
    %130 = vector.shape_cast %129 : vector<1x8x128xf32> to vector<8x128xf32>
    %131 = vector.shape_cast %127 : vector<8x128xf32> to vector<1x8x128xf32>
    tpu.vector_store %arg7[%128, %c0_74, %c0_75], %131 {strides = array<i32>} : memref<8x8x128xf32, #tpu.memory_space<vmem>>, vector<1x8x128xf32>,
    %c8_i32 = arith.constant 8 : i32
    %c0_76 = arith.constant 0 : index
    %c0_77 = arith.constant 0 : index
    %132 = vector.load %arg8[%c0_76, %c0_77] : memref<8x128xf32, #tpu.memory_space<vmem>>, vector<8x128xf32>
    tpu.vector_store %arg8[%c0_76, %c0_77], %127 {strides = array<i32>} : memref<8x128xf32, #tpu.memory_space<vmem>>, vector<8x128xf32>,
    return
  }
  func.func @transform_0(%arg0: i32, %arg1: i32) -> (i32, i32, i32) {
    %c0_i32 = arith.constant 0 : i32
    %c0_i32_0 = arith.constant 0 : i32
    return %arg1, %arg0, %c0_i32 : i32, i32, i32
  }
  func.func @transform_1(%arg0: i32, %arg1: i32) -> (i32, i32) {
    %c0_i32 = arith.constant 0 : i32
    %c0_i32_0 = arith.constant 0 : i32
    %c0_i32_1 = arith.constant 0 : i32
    return %c0_i32, %c0_i32_0 : i32, i32
  }
  func.func @transform_2(%arg0: i32, %arg1: i32) -> (i32, i32) {
    %c0_i32 = arith.constant 0 : i32
    %c0_i32_0 = arith.constant 0 : i32
    %c0_i32_1 = arith.constant 0 : i32
    return %c0_i32, %c0_i32_0 : i32, i32
  }
  func.func @transform_3(%arg0: i32, %arg1: i32) -> (i32, i32) {
    %c0_i32 = arith.constant 0 : i32
    %c0_i32_0 = arith.constant 0 : i32
    %c0_i32_1 = arith.constant 0 : i32
    return %c0_i32, %c0_i32_0 : i32, i32
  }
  func.func @transform_4(%arg0: i32, %arg1: i32) -> (i32, i32) {
    %c0_i32 = arith.constant 0 : i32
    %c0_i32_0 = arith.constant 0 : i32
    return %arg0, %c0_i32 : i32, i32
  }
  func.func @transform_5(%arg0: i32, %arg1: i32) -> (i32, i32, i32) {
    %c0_i32 = arith.constant 0 : i32
    %c0_i32_0 = arith.constant 0 : i32
    return %arg1, %arg0, %c0_i32 : i32, i32, i32
  }
}

module attributes {stable_mosaic.version = 11 : i64} {
  func.func @_rnn_kernel(%arg0: i32, %arg1: i32, %arg2: memref<8x8x16xf32, #tpu.memory_space<vmem>>, %arg3: memref<16x128xf32, #tpu.memory_space<vmem>>, %arg4: memref<128x128xf32, #tpu.memory_space<vmem>>, %arg5: memref<1x128xf32, #tpu.memory_space<vmem>>, %arg6: memref<8x128xf32, #tpu.memory_space<vmem>>, %arg7: memref<8x8x128xf32, #tpu.memory_space<vmem>>, %arg8: memref<8x128xf32, #tpu.memory_space<vmem>>) attributes {dimension_semantics = [#tpu.dimension_semantics<parallel>, #tpu.dimension_semantics<arbitrary>], iteration_bounds = array<i64: 1, 2>, scalar_prefetch = 0 : i64, scratch_operands = 1 : i64, tpu.core_type = #tpu.core_type<tc>, window_params = [{transform_indices = @transform_0, window_bounds = array<i64: 8, 8, 16>}, {pipeline_mode = #tpu.pipeline_mode<synchronous>, transform_indices = @transform_1, window_bounds = array<i64: 16, 128>}, {pipeline_mode = #tpu.pipeline_mode<synchronous>, transform_indices = @transform_2, window_bounds = array<i64: 128, 128>}, {pipeline_mode = #tpu.pipeline_mode<synchronous>, transform_indices = @transform_3, window_bounds = array<i64: 1, 128>}, {transform_indices = @transform_4, window_bounds = array<i64: 8, 128>}, {transform_indices = @transform_5, window_bounds = array<i64: 8, 8, 128>}]} {
    %c0_i32 = arith.constant 0 : i32
    %0 = arith.cmpi eq, %arg1, %c0_i32 : i32
    %1 = arith.extui %0 : i1 to i32
    %c0_i32_0 = arith.constant 0 : i32
    %2 = arith.cmpi ne, %1, %c0_i32_0 : i32
    scf.if %2 {
      %c0_78 = arith.constant 0 : index
      %c0_79 = arith.constant 0 : index
      %133 = vector.load %arg6[%c0_78, %c0_79] : memref<8x128xf32, #tpu.memory_space<vmem>>, vector<8x128xf32>
      %c0_80 = arith.constant 0 : index
      %c0_81 = arith.constant 0 : index
      %134 = vector.load %arg8[%c0_80, %c0_81] : memref<8x128xf32, #tpu.memory_space<vmem>>, vector<8x128xf32>
      tpu.vector_store %arg8[%c0_80, %c0_81], %133 {strides = array<i32>} : memref<8x128xf32, #tpu.memory_space<vmem>>, vector<8x128xf32>,
    } else {
    }
    %c0 = arith.constant 0 : index
    %c0_1 = arith.constant 0 : index
    %3 = vector.load %arg3[%c0, %c0_1] : memref<16x128xf32, #tpu.memory_space<vmem>>, vector<16x128xf32>
    %c0_2 = arith.constant 0 : index
    %c0_3 = arith.constant 0 : index
    %4 = vector.load %arg4[%c0_2, %c0_3] : memref<128x128xf32, #tpu.memory_space<vmem>>, vector<128x128xf32>
    %c0_4 = arith.constant 0 : index
    %c0_5 = arith.constant 0 : index
    %5 = vector.load %arg5[%c0_4, %c0_5] : memref<1x128xf32, #tpu.memory_space<vmem>>, vector<1x128xf32>
    %c0_6 = arith.constant 0 : index
    %c0_7 = arith.constant 0 : index
    %6 = vector.load %arg8[%c0_6, %c0_7] : memref<8x128xf32, #tpu.memory_space<vmem>>, vector<8x128xf32>
    %c0_8 = arith.constant 0 : index
    %c0_9 = arith.constant 0 : index
    %c0_10 = arith.constant 0 : index
    %7 = vector.load %arg2[%c0_8, %c0_9, %c0_10] : memref<8x8x16xf32, #tpu.memory_space<vmem>>, vector<1x8x16xf32>
    %8 = vector.shape_cast %7 : vector<1x8x16xf32> to vector<8x16xf32>
    %cst = arith.constant dense<0.000000e+00> : vector<8x128xf32>
    %9 = tpu.matmul %8, %3, %cst {dimension_numbers = #tpu.dot_dimension_numbers<[1], [0], [0], [1], [0, 0, 1, 1], [], []>} : vector<8x16xf32>, vector<16x128xf32>, vector<8x128xf32> -> vector<8x128xf32>
    %10 = vector.broadcast %5 : vector<1x128xf32> to vector<8x128xf32>
    %11 = arith.addf %9, %10 : vector<8x128xf32>
    %c0_i32_11 = arith.constant 0 : i32
    %c1_i32 = arith.constant 1 : i32
    %12 = arith.addi %c0_i32_11, %c1_i32 : i32
    %c7_i32 = arith.constant 7 : i32
    %13 = arith.minsi %12, %c7_i32 : i32
    %14 = arith.index_cast %13 : i32 to index
    %c0_12 = arith.constant 0 : index
    %c0_13 = arith.constant 0 : index
    %15 = vector.load %arg2[%14, %c0_12, %c0_13] : memref<8x8x16xf32, #tpu.memory_space<vmem>>, vector<1x8x16xf32>
    %16 = vector.shape_cast %15 : vector<1x8x16xf32> to vector<8x16xf32>
    %cst_14 = arith.constant dense<0.000000e+00> : vector<8x128xf32>
    %17 = tpu.matmul %16, %3, %cst_14 {dimension_numbers = #tpu.dot_dimension_numbers<[1], [0], [0], [1], [0, 0, 1, 1], [], []>} : vector<8x16xf32>, vector<16x128xf32>, vector<8x128xf32> -> vector<8x128xf32>
    %18 = vector.broadcast %5 : vector<1x128xf32> to vector<8x128xf32>
    %19 = arith.addf %17, %18 : vector<8x128xf32>
    %cst_15 = arith.constant dense<0.000000e+00> : vector<8x128xf32>
    %20 = tpu.matmul %6, %4, %cst_15 {dimension_numbers = #tpu.dot_dimension_numbers<[1], [0], [0], [1], [0, 0, 1, 1], [], []>} : vector<8x128xf32>, vector<128x128xf32>, vector<8x128xf32> -> vector<8x128xf32>
    %21 = arith.addf %20, %11 : vector<8x128xf32>
    %22 = math.tanh %21 : vector<8x128xf32>
    %23 = arith.index_cast %c0_i32_11 : i32 to index
    %c0_16 = arith.constant 0 : index
    %c0_17 = arith.constant 0 : index
    %24 = vector.load %arg7[%23, %c0_16, %c0_17] : memref<8x8x128xf32, #tpu.memory_space<vmem>>, vector<1x8x128xf32>
    %25 = vector.shape_cast %24 : vector<1x8x128xf32> to vector<8x128xf32>
    %26 = vector.shape_cast %22 : vector<8x128xf32> to vector<1x8x128xf32>
    tpu.vector_store %arg7[%23, %c0_16, %c0_17], %26 {strides = array<i32>} : memref<8x8x128xf32, #tpu.memory_space<vmem>>, vector<1x8x128xf32>,
    %c1_i32_18 = arith.constant 1 : i32
    %c1_i32_19 = arith.constant 1 : i32
    %27 = arith.addi %c1_i32_18, %c1_i32_19 : i32
    %c7_i32_20 = arith.constant 7 : i32
    %28 = arith.minsi %27, %c7_i32_20 : i32
    %29 = arith.index_cast %28 : i32 to index
    %c0_21 = arith.constant 0 : index
    %c0_22 = arith.constant 0 : index
    %30 = vector.load %arg2[%29, %c0_21, %c0_22] : memref<8x8x16xf32, #tpu.memory_space<vmem>>, vector<1x8x16xf32>
    %31 = vector.shape_cast %30 : vector<1x8x16xf32> to vector<8x16xf32>
    %cst_23 = arith.constant dense<0.000000e+00> : vector<8x128xf32>
    %32 = tpu.matmul %31, %3, %cst_23 {dimension_numbers = #tpu.dot_dimension_numbers<[1], [0], [0], [1], [0, 0, 1, 1], [], []>} : vector<8x16xf32>, vector<16x128xf32>, vector<8x128xf32> -> vector<8x128xf32>
    %33 = vector.broadcast %5 : vector<1x128xf32> to vector<8x128xf32>
    %34 = arith.addf %32, %33 : vector<8x128xf32>
    %cst_24 = arith.constant dense<0.000000e+00> : vector<8x128xf32>
    %35 = tpu.matmul %22, %4, %cst_24 {dimension_numbers = #tpu.dot_dimension_numbers<[1], [0], [0], [1], [0, 0, 1, 1], [], []>} : vector<8x128xf32>, vector<128x128xf32>, vector<8x128xf32> -> vector<8x128xf32>
    %36 = arith.addf %35, %19 : vector<8x128xf32>
    %37 = math.tanh %36 : vector<8x128xf32>
    %38 = arith.index_cast %c1_i32_18 : i32 to index
    %c0_25 = arith.constant 0 : index
    %c0_26 = arith.constant 0 : index
    %39 = vector.load %arg7[%38, %c0_25, %c0_26] : memref<8x8x128xf32, #tpu.memory_space<vmem>>, vector<1x8x128xf32>
    %40 = vector.shape_cast %39 : vector<1x8x128xf32> to vector<8x128xf32>
    %41 = vector.shape_cast %37 : vector<8x128xf32> to vector<1x8x128xf32>
    tpu.vector_store %arg7[%38, %c0_25, %c0_26], %41 {strides = array<i32>} : memref<8x8x128xf32, #tpu.memory_space<vmem>>, vector<1x8x128xf32>,
    %c2_i32 = arith.constant 2 : i32
    %c1_i32_27 = arith.constant 1 : i32
    %42 = arith.addi %c2_i32, %c1_i32_27 : i32
    %c7_i32_28 = arith.constant 7 : i32
    %43 = arith.minsi %42, %c7_i32_28 : i32
    %44 = arith.index_cast %43 : i32 to index
    %c0_29 = arith.constant 0 : index
    %c0_30 = arith.constant 0 : index
    %45 = vector.load %arg2[%44, %c0_29, %c0_30] : memref<8x8x16xf32, #tpu.memory_space<vmem>>, vector<1x8x16xf32>
    %46 = vector.shape_cast %45 : vector<1x8x16xf32> to vector<8x16xf32>
    %cst_31 = arith.constant dense<0.000000e+00> : vector<8x128xf32>
    %47 = tpu.matmul %46, %3, %cst_31 {dimension_numbers = #tpu.dot_dimension_numbers<[1], [0], [0], [1], [0, 0, 1, 1], [], []>} : vector<8x16xf32>, vector<16x128xf32>, vector<8x128xf32> -> vector<8x128xf32>
    %48 = vector.broadcast %5 : vector<1x128xf32> to vector<8x128xf32>
    %49 = arith.addf %47, %48 : vector<8x128xf32>
    %cst_32 = arith.constant dense<0.000000e+00> : vector<8x128xf32>
    %50 = tpu.matmul %37, %4, %cst_32 {dimension_numbers = #tpu.dot_dimension_numbers<[1], [0], [0], [1], [0, 0, 1, 1], [], []>} : vector<8x128xf32>, vector<128x128xf32>, vector<8x128xf32> -> vector<8x128xf32>
    %51 = arith.addf %50, %34 : vector<8x128xf32>
    %52 = math.tanh %51 : vector<8x128xf32>
    %53 = arith.index_cast %c2_i32 : i32 to index
    %c0_33 = arith.constant 0 : index
    %c0_34 = arith.constant 0 : index
    %54 = vector.load %arg7[%53, %c0_33, %c0_34] : memref<8x8x128xf32, #tpu.memory_space<vmem>>, vector<1x8x128xf32>
    %55 = vector.shape_cast %54 : vector<1x8x128xf32> to vector<8x128xf32>
    %56 = vector.shape_cast %52 : vector<8x128xf32> to vector<1x8x128xf32>
    tpu.vector_store %arg7[%53, %c0_33, %c0_34], %56 {strides = array<i32>} : memref<8x8x128xf32, #tpu.memory_space<vmem>>, vector<1x8x128xf32>,
    %c3_i32 = arith.constant 3 : i32
    %c1_i32_35 = arith.constant 1 : i32
    %57 = arith.addi %c3_i32, %c1_i32_35 : i32
    %c7_i32_36 = arith.constant 7 : i32
    %58 = arith.minsi %57, %c7_i32_36 : i32
    %59 = arith.index_cast %58 : i32 to index
    %c0_37 = arith.constant 0 : index
    %c0_38 = arith.constant 0 : index
    %60 = vector.load %arg2[%59, %c0_37, %c0_38] : memref<8x8x16xf32, #tpu.memory_space<vmem>>, vector<1x8x16xf32>
    %61 = vector.shape_cast %60 : vector<1x8x16xf32> to vector<8x16xf32>
    %cst_39 = arith.constant dense<0.000000e+00> : vector<8x128xf32>
    %62 = tpu.matmul %61, %3, %cst_39 {dimension_numbers = #tpu.dot_dimension_numbers<[1], [0], [0], [1], [0, 0, 1, 1], [], []>} : vector<8x16xf32>, vector<16x128xf32>, vector<8x128xf32> -> vector<8x128xf32>
    %63 = vector.broadcast %5 : vector<1x128xf32> to vector<8x128xf32>
    %64 = arith.addf %62, %63 : vector<8x128xf32>
    %cst_40 = arith.constant dense<0.000000e+00> : vector<8x128xf32>
    %65 = tpu.matmul %52, %4, %cst_40 {dimension_numbers = #tpu.dot_dimension_numbers<[1], [0], [0], [1], [0, 0, 1, 1], [], []>} : vector<8x128xf32>, vector<128x128xf32>, vector<8x128xf32> -> vector<8x128xf32>
    %66 = arith.addf %65, %49 : vector<8x128xf32>
    %67 = math.tanh %66 : vector<8x128xf32>
    %68 = arith.index_cast %c3_i32 : i32 to index
    %c0_41 = arith.constant 0 : index
    %c0_42 = arith.constant 0 : index
    %69 = vector.load %arg7[%68, %c0_41, %c0_42] : memref<8x8x128xf32, #tpu.memory_space<vmem>>, vector<1x8x128xf32>
    %70 = vector.shape_cast %69 : vector<1x8x128xf32> to vector<8x128xf32>
    %71 = vector.shape_cast %67 : vector<8x128xf32> to vector<1x8x128xf32>
    tpu.vector_store %arg7[%68, %c0_41, %c0_42], %71 {strides = array<i32>} : memref<8x8x128xf32, #tpu.memory_space<vmem>>, vector<1x8x128xf32>,
    %c4_i32 = arith.constant 4 : i32
    %c1_i32_43 = arith.constant 1 : i32
    %72 = arith.addi %c4_i32, %c1_i32_43 : i32
    %c7_i32_44 = arith.constant 7 : i32
    %73 = arith.minsi %72, %c7_i32_44 : i32
    %74 = arith.index_cast %73 : i32 to index
    %c0_45 = arith.constant 0 : index
    %c0_46 = arith.constant 0 : index
    %75 = vector.load %arg2[%74, %c0_45, %c0_46] : memref<8x8x16xf32, #tpu.memory_space<vmem>>, vector<1x8x16xf32>
    %76 = vector.shape_cast %75 : vector<1x8x16xf32> to vector<8x16xf32>
    %cst_47 = arith.constant dense<0.000000e+00> : vector<8x128xf32>
    %77 = tpu.matmul %76, %3, %cst_47 {dimension_numbers = #tpu.dot_dimension_numbers<[1], [0], [0], [1], [0, 0, 1, 1], [], []>} : vector<8x16xf32>, vector<16x128xf32>, vector<8x128xf32> -> vector<8x128xf32>
    %78 = vector.broadcast %5 : vector<1x128xf32> to vector<8x128xf32>
    %79 = arith.addf %77, %78 : vector<8x128xf32>
    %cst_48 = arith.constant dense<0.000000e+00> : vector<8x128xf32>
    %80 = tpu.matmul %67, %4, %cst_48 {dimension_numbers = #tpu.dot_dimension_numbers<[1], [0], [0], [1], [0, 0, 1, 1], [], []>} : vector<8x128xf32>, vector<128x128xf32>, vector<8x128xf32> -> vector<8x128xf32>
    %81 = arith.addf %80, %64 : vector<8x128xf32>
    %82 = math.tanh %81 : vector<8x128xf32>
    %83 = arith.index_cast %c4_i32 : i32 to index
    %c0_49 = arith.constant 0 : index
    %c0_50 = arith.constant 0 : index
    %84 = vector.load %arg7[%83, %c0_49, %c0_50] : memref<8x8x128xf32, #tpu.memory_space<vmem>>, vector<1x8x128xf32>
    %85 = vector.shape_cast %84 : vector<1x8x128xf32> to vector<8x128xf32>
    %86 = vector.shape_cast %82 : vector<8x128xf32> to vector<1x8x128xf32>
    tpu.vector_store %arg7[%83, %c0_49, %c0_50], %86 {strides = array<i32>} : memref<8x8x128xf32, #tpu.memory_space<vmem>>, vector<1x8x128xf32>,
    %c5_i32 = arith.constant 5 : i32
    %c1_i32_51 = arith.constant 1 : i32
    %87 = arith.addi %c5_i32, %c1_i32_51 : i32
    %c7_i32_52 = arith.constant 7 : i32
    %88 = arith.minsi %87, %c7_i32_52 : i32
    %89 = arith.index_cast %88 : i32 to index
    %c0_53 = arith.constant 0 : index
    %c0_54 = arith.constant 0 : index
    %90 = vector.load %arg2[%89, %c0_53, %c0_54] : memref<8x8x16xf32, #tpu.memory_space<vmem>>, vector<1x8x16xf32>
    %91 = vector.shape_cast %90 : vector<1x8x16xf32> to vector<8x16xf32>
    %cst_55 = arith.constant dense<0.000000e+00> : vector<8x128xf32>
    %92 = tpu.matmul %91, %3, %cst_55 {dimension_numbers = #tpu.dot_dimension_numbers<[1], [0], [0], [1], [0, 0, 1, 1], [], []>} : vector<8x16xf32>, vector<16x128xf32>, vector<8x128xf32> -> vector<8x128xf32>
    %93 = vector.broadcast %5 : vector<1x128xf32> to vector<8x128xf32>
    %94 = arith.addf %92, %93 : vector<8x128xf32>
    %cst_56 = arith.constant dense<0.000000e+00> : vector<8x128xf32>
    %95 = tpu.matmul %82, %4, %cst_56 {dimension_numbers = #tpu.dot_dimension_numbers<[1], [0], [0], [1], [0, 0, 1, 1], [], []>} : vector<8x128xf32>, vector<128x128xf32>, vector<8x128xf32> -> vector<8x128xf32>
    %96 = arith.addf %95, %79 : vector<8x128xf32>
    %97 = math.tanh %96 : vector<8x128xf32>
    %98 = arith.index_cast %c5_i32 : i32 to index
    %c0_57 = arith.constant 0 : index
    %c0_58 = arith.constant 0 : index
    %99 = vector.load %arg7[%98, %c0_57, %c0_58] : memref<8x8x128xf32, #tpu.memory_space<vmem>>, vector<1x8x128xf32>
    %100 = vector.shape_cast %99 : vector<1x8x128xf32> to vector<8x128xf32>
    %101 = vector.shape_cast %97 : vector<8x128xf32> to vector<1x8x128xf32>
    tpu.vector_store %arg7[%98, %c0_57, %c0_58], %101 {strides = array<i32>} : memref<8x8x128xf32, #tpu.memory_space<vmem>>, vector<1x8x128xf32>,
    %c6_i32 = arith.constant 6 : i32
    %c1_i32_59 = arith.constant 1 : i32
    %102 = arith.addi %c6_i32, %c1_i32_59 : i32
    %c7_i32_60 = arith.constant 7 : i32
    %103 = arith.minsi %102, %c7_i32_60 : i32
    %104 = arith.index_cast %103 : i32 to index
    %c0_61 = arith.constant 0 : index
    %c0_62 = arith.constant 0 : index
    %105 = vector.load %arg2[%104, %c0_61, %c0_62] : memref<8x8x16xf32, #tpu.memory_space<vmem>>, vector<1x8x16xf32>
    %106 = vector.shape_cast %105 : vector<1x8x16xf32> to vector<8x16xf32>
    %cst_63 = arith.constant dense<0.000000e+00> : vector<8x128xf32>
    %107 = tpu.matmul %106, %3, %cst_63 {dimension_numbers = #tpu.dot_dimension_numbers<[1], [0], [0], [1], [0, 0, 1, 1], [], []>} : vector<8x16xf32>, vector<16x128xf32>, vector<8x128xf32> -> vector<8x128xf32>
    %108 = vector.broadcast %5 : vector<1x128xf32> to vector<8x128xf32>
    %109 = arith.addf %107, %108 : vector<8x128xf32>
    %cst_64 = arith.constant dense<0.000000e+00> : vector<8x128xf32>
    %110 = tpu.matmul %97, %4, %cst_64 {dimension_numbers = #tpu.dot_dimension_numbers<[1], [0], [0], [1], [0, 0, 1, 1], [], []>} : vector<8x128xf32>, vector<128x128xf32>, vector<8x128xf32> -> vector<8x128xf32>
    %111 = arith.addf %110, %94 : vector<8x128xf32>
    %112 = math.tanh %111 : vector<8x128xf32>
    %113 = arith.index_cast %c6_i32 : i32 to index
    %c0_65 = arith.constant 0 : index
    %c0_66 = arith.constant 0 : index
    %114 = vector.load %arg7[%113, %c0_65, %c0_66] : memref<8x8x128xf32, #tpu.memory_space<vmem>>, vector<1x8x128xf32>
    %115 = vector.shape_cast %114 : vector<1x8x128xf32> to vector<8x128xf32>
    %116 = vector.shape_cast %112 : vector<8x128xf32> to vector<1x8x128xf32>
    tpu.vector_store %arg7[%113, %c0_65, %c0_66], %116 {strides = array<i32>} : memref<8x8x128xf32, #tpu.memory_space<vmem>>, vector<1x8x128xf32>,
    %c7_i32_67 = arith.constant 7 : i32
    %c1_i32_68 = arith.constant 1 : i32
    %117 = arith.addi %c7_i32_67, %c1_i32_68 : i32
    %c7_i32_69 = arith.constant 7 : i32
    %118 = arith.minsi %117, %c7_i32_69 : i32
    %119 = arith.index_cast %118 : i32 to index
    %c0_70 = arith.constant 0 : index
    %c0_71 = arith.constant 0 : index
    %120 = vector.load %arg2[%119, %c0_70, %c0_71] : memref<8x8x16xf32, #tpu.memory_space<vmem>>, vector<1x8x16xf32>
    %121 = vector.shape_cast %120 : vector<1x8x16xf32> to vector<8x16xf32>
    %cst_72 = arith.constant dense<0.000000e+00> : vector<8x128xf32>
    %122 = tpu.matmul %121, %3, %cst_72 {dimension_numbers = #tpu.dot_dimension_numbers<[1], [0], [0], [1], [0, 0, 1, 1], [], []>} : vector<8x16xf32>, vector<16x128xf32>, vector<8x128xf32> -> vector<8x128xf32>
    %123 = vector.broadcast %5 : vector<1x128xf32> to vector<8x128xf32>
    %124 = arith.addf %122, %123 : vector<8x128xf32>
    %cst_73 = arith.constant dense<0.000000e+00> : vector<8x128xf32>
    %125 = tpu.matmul %112, %4, %cst_73 {dimension_numbers = #tpu.dot_dimension_numbers<[1], [0], [0], [1], [0, 0, 1, 1], [], []>} : vector<8x128xf32>, vector<128x128xf32>, vector<8x128xf32> -> vector<8x128xf32>
    %126 = arith.addf %125, %109 : vector<8x128xf32>
    %127 = math.tanh %126 : vector<8x128xf32>
    %128 = arith.index_cast %c7_i32_67 : i32 to index
    %c0_74 = arith.constant 0 : index
    %c0_75 = arith.constant 0 : index
    %129 = vector.load %arg7[%128, %c0_74, %c0_75] : memref<8x8x128xf32, #tpu.memory_space<vmem>>, vector<1x8x128xf32>
    %130 = vector.shape_cast %129 : vector<1x8x128xf32> to vector<8x128xf32>
    %131 = vector.shape_cast %127 : vector<8x128xf32> to vector<1x8x128xf32>
    tpu.vector_store %arg7[%128, %c0_74, %c0_75], %131 {strides = array<i32>} : memref<8x8x128xf32, #tpu.memory_space<vmem>>, vector<1x8x128xf32>,
    %c8_i32 = arith.constant 8 : i32
    %c0_76 = arith.constant 0 : index
    %c0_77 = arith.constant 0 : index
    %132 = vector.load %arg8[%c0_76, %c0_77] : memref<8x128xf32, #tpu.memory_space<vmem>>, vector<8x128xf32>
    tpu.vector_store %arg8[%c0_76, %c0_77], %127 {strides = array<i32>} : memref<8x128xf32, #tpu.memory_space<vmem>>, vector<8x128xf32>,
    return
  }
  func.func @transform_0(%arg0: i32, %arg1: i32) -> (i32, i32, i32) {
    %c0_i32 = arith.constant 0 : i32
    %c0_i32_0 = arith.constant 0 : i32
    return %arg1, %arg0, %c0_i32 : i32, i32, i32
  }
  func.func @transform_1(%arg0: i32, %arg1: i32) -> (i32, i32) {
    %c0_i32 = arith.constant 0 : i32
    %c0_i32_0 = arith.constant 0 : i32
    %c0_i32_1 = arith.constant 0 : i32
    return %c0_i32, %c0_i32_0 : i32, i32
  }
  func.func @transform_2(%arg0: i32, %arg1: i32) -> (i32, i32) {
    %c0_i32 = arith.constant 0 : i32
    %c0_i32_0 = arith.constant 0 : i32
    %c0_i32_1 = arith.constant 0 : i32
    return %c0_i32, %c0_i32_0 : i32, i32
  }
  func.func @transform_3(%arg0: i32, %arg1: i32) -> (i32, i32) {
    %c0_i32 = arith.constant 0 : i32
    %c0_i32_0 = arith.constant 0 : i32
    %c0_i32_1 = arith.constant 0 : i32
    return %c0_i32, %c0_i32_0 : i32, i32
  }
  func.func @transform_4(%arg0: i32, %arg1: i32) -> (i32, i32) {
    %c0_i32 = arith.constant 0 : i32
    %c0_i32_0 = arith.constant 0 : i32
    return %arg0, %c0_i32 : i32, i32
  }
  func.func @transform_5(%arg0: i32, %arg1: i32) -> (i32, i32, i32) {
    %c0_i32 = arith.constant 0 : i32
    %c0_i32_0 = arith.constant 0 : i32
    return %arg1, %arg0, %c0_i32 : i32, i32, i32
  }
}

</mosaic_0001>

<bundles_post_ra>
// kernel: tpu_custom_call.1
= control target key start
LH: loop header
LB: loop body
LE: loop exit
PB: predicated region body
PF: predicated region fallthrough
CT: control target
= control target key end

     0   :  { %10 = vsyncpa [#allocation4], 0  ;;  %s3265_s0 = inlined_call_operand.hbm [shape: f32[16,8,16], index: 0, kind: input, shape index: {}]   ;;  %s3266_s1 = inlined_call_operand.hbm [shape: f32[16,128], index: 1, kind: input, shape index: {}]   ;;  %s3267_s2 = inlined_call_operand.hbm [shape: f32[128,128], index: 2, kind: input, shape index: {}]   ;;  %s3268_s3 = inlined_call_operand.vmem [shape: f32[1,128], index: 3, kind: input, shape index: {}]   ;;  %s3269_s4 = inlined_call_operand.vmem [shape: f32[8,128], index: 4, kind: input, shape index: {}]   ;;  %s3270_s5 = inlined_call_operand.hbm [shape: f32[16,8,128], index: 5, kind: output, shape index: {}]  }
   0x1   :  { %12 = vsyncpa [#allocation4 + $0x1], 0 }
   0x2   :  { %13 = vsyncpa [#allocation7], 0 }
   0x3   :  { %14 = vsyncpa [#allocation5], 0 }
   0x4   :  { %16 = vsyncpa [#allocation5 + $0x1], 0  ;;  %s2761_s18 = smov 0   ;;  %s2763_s19 = smov 0  }
   0x5   :  { %s2765_s20 = smov 0   ;;  %s2767_s21 = smov 0  }
   0x6   :  { %s2769_s22 = smov 0   ;;  %s2771_s23 = smov 0  }
   0x7 LB: > { %s1658_s24 = sadd.s32 4294967295, %s2718_s23   ;;  %s1659_s25 = sadd.s32 4294967294, %s2718_s23   ;;  %s2718_s23 = sphi %s2771_s23, %s22_s23   ;;  %s2714_s22 = sphi %s2769_s22, %s3294_s22   ;;  %s2710_s21 = sphi %s2767_s21, %s3293_s21   ;;  %s2706_s20 = sphi %s2765_s20, %s3292_s20   ;;  %s2702_s19 = sphi %s2763_s19, %s3291_s19   ;;  %s2698_s18 = sphi %s2761_s18, %s3290_s18  }
   0x8   : > { %p56_p0 = scmp.ne.s32.totalorder %s2702_s19, %s2698_s18  ;;  %p2795_p1 = scmp.eq.s32.totalorder %s1658_s24, 0 }
   0x9   : > { %p2799_p2 = scmp.eq.s32.totalorder %s1658_s24, 1  ;;  %p177_p3 = scmp.eq.s32.totalorder %s1659_s25, 1 }
   0xa   : > { %s3276_s26 = scalar_select %p2795_p1, 1, 0 }
   0xb   : > { %p2805_p4 = por %p2795_p1, %p56_p0  ;;  %p1660_p5 = scmp.ge.s32.totalorder %s2718_s23, 1 }
   0xc   : > { %p2810_p6 = por %p177_p3, %p56_p0  ;;  %p184_p7 = scmp.lt.s32.totalorder %s2718_s23, 3 }
   0xd   : > { %s3278_s28 = scalar_select %p2805_p4, 1, 0 }
   0xe   : > { %s3279_s29 = scalar_select %p2810_p6, 1, 0 }
   0xf   : > { %p2815_p8 = pnand %p1660_p5, %p184_p7  ;;  %s2720_s6 = smov [#allocation6]  }
  0x10   : > { %s196_s7 = sshll.u32 %s2720_s6, 4  ;;  %s2721_s9 = smov [#allocation8]   ;;  %s2819_s7 = int_to_ptr.vmem [resolvable:$true] %s196_s7 }
  0x11   : > { %p2452_p9 = pneg %p2815_p8  ;;  %s209_s10 = sshll.u32 %s2721_s9, 4  ;;  %s2830_s10 = int_to_ptr.vmem [resolvable:$true] %s209_s10 }
  0x12   : > { %s2546_s13 = scalar_lea.hbm %s3266_s1, 256 }
  0x13   : > { %p2826_p11 = pnand %p2452_p9, %p2795_p1  ;;  %p2547_p12 = scmp.ne.s32.totalorder %s3266_s1, %s2546_s13 }
  0x14   : > { %p2553_p5 = scmp.lt.u32.totalorder %s2546_s13, %s3266_s1 }
  0x15   : > { %p2548_p13 = pneg %p2826_p11 }
  0x17   : > { %p2549_p0 = pnand %p2548_p13, %p2547_p12 }
  0x19   : > { %p2550_p3 = pneg %p2549_p0 }
  0x1b   : > { %p2555_p7 = pnand %p2553_p5, %p2550_p3 }
  0x1d   : > { %2558 = shalt.err (!%p2555_p7)
}
  0x1e   : > { %s2559_s24 = scalar_lea.vmem %s2819_s7, 256  ;;  %p2567_p1 = scmp.lt.s32.totalorder %s2819_s7, %s2819_s7 }
  0x1f   : > { %p2560_p9 = scmp.ne.s32.totalorder %s2819_s7, %s2559_s24  ;;  %p2568_p12 = scmp.lt.s32.totalorder %s2559_s24, %s2559_s24 }
  0x21   : > { %p2562_p10 = pnand %p2560_p9, %p2548_p13  ;;  %p2569_p0 = por %p2568_p12, %p2567_p1 }
  0x23   : > { %p2563_p6 = pneg %p2562_p10 }
  0x25   : > { %p2570_p4 = pnand %p2569_p0, %p2563_p6 }
  0x27   : > { %2573 = shalt.err (!%p2570_p4)
}
  0x28   : > { %s3274_s25 = smov 128   ;;  %s2723_s6 = smov 8  }
  0x29   : > { %2455 = dma.hbm_to_vmem [thread:$0]  (!%p2826_p11), %s3266_s1, 256, %s2819_s7, [#allocation7], %s3274_s25, %s3274_s25, %s2723_s6  }
  0x2a   : > { %s2574_s14 = scalar_lea.hbm %s3267_s2, 2048 }
  0x2b   : > { %p2575_p1 = scmp.ne.s32.totalorder %s3267_s2, %s2574_s14  ;;  %p2581_p10 = scmp.lt.u32.totalorder %s2574_s14, %s3267_s2 }
  0x2d   : > { %p2577_p4 = pnand %p2575_p1, %p2548_p13 }
  0x2f   : > { %p2578_p6 = pneg %p2577_p4 }
  0x31   : > { %p2583_p3 = pnand %p2581_p10, %p2578_p6 }
  0x33   : > { %2586 = shalt.err (!%p2583_p3)
}
  0x34   : > { %s2587_s7 = scalar_lea.vmem %s2830_s10, 2048  ;;  %p2595_p12 = scmp.lt.s32.totalorder %s2830_s10, %s2830_s10 }
  0x35   : > { %p2588_p5 = scmp.ne.s32.totalorder %s2830_s10, %s2587_s7  ;;  %p2596_p0 = scmp.lt.s32.totalorder %s2587_s7, %s2587_s7 }
  0x37   : > { %p2590_p7 = pnand %p2588_p5, %p2548_p13  ;;  %p2597_p1 = por %p2596_p0, %p2595_p12 }
  0x39   : > { %p2591_p9 = pneg %p2590_p7 }
  0x3b   : > { %p2598_p4 = pnand %p2597_p1, %p2591_p9 }
  0x3d   : > { %2601 = shalt.err (!%p2598_p4)
}
  0x3e   : > { %2458 = dma.hbm_to_vmem [thread:$0]  (!%p2826_p11), %s3267_s2, 2048, %s2830_s10, [#allocation7], %s3274_s25, %s3274_s25, %s2723_s6  }
  0x3f   : > { %s31_s8 = sadd.s32 1, %s2714_s22  ;;  %s43_s12 = sadd.s32 1, %s2706_s20 }
  0x40   : > { %p32_p13 = scmp.ge.s32.totalorder %s31_s8, 2  ;;  %p50_p6 = scmp.ne.s32.totalorder %s2706_s20, %s2702_s19 }
  0x41   : > { %p51_p10 = scmp.eq.s32.totalorder %s2718_s23, 0  ;;  %p2469_p3 = scmp.lt.s32.totalorder %s2718_s23, 2 }
  0x42   : > { %s3296_s8 = smov (%p32_p13, %s31_s8), 0  ;;  %p2900_p7 = por %p2799_p2, %p50_p6 }
  0x43   : > { %p52_p5 = por %p51_p10, %p50_p6  ;;  %s38_s14 = ssub.s32 %s2714_s22, %s3296_s8 }
  0x44   : > { %s3282_s13 = scalar_select %p2900_p7, 1, 0 }
  0x45   : > { %s233_s15 = sand.u32 1, %s2706_s20   ;;  %p41_p9 = scmp.eq.s32.totalorder %s38_s14, 0 }
  0x46   : > { %s1665_s10 = sshll.u32 %s233_s15, 6  ;;  %s1702_s16 = sshll.u32 %s2714_s22, 10 }
  0x47   : > { %s2909_s17 = scalar_select %p41_p9, %s2706_s20, %s43_s12  }
  0x48   : > { %s2914_s9 = scalar_lea.hbm %s3265_s0, %s1702_s16  ;;  %s237_s27 = scalar_lea.vmem [#allocation3], %s1665_s10 }
  0x49   : > { %s245_s11 = sshll.u32 %s237_s27, 4  ;;  %p2918_p2 = pnand %p2469_p3, %p52_p5  ;;  %s2922_s11 = int_to_ptr.vmem [resolvable:$true] %s245_s11 }
  0x4a   : > { %s2924_s12 = scalar_lea.sflag [#allocation4], %s233_s15  ;;  %s2602_s14 = scalar_lea.hbm %s2914_s9, 1024 }
  0x4b   : > { %p2603_p11 = scmp.ne.s32.totalorder %s2914_s9, %s2602_s14  ;;  %p2604_p12 = pneg %p2918_p2 }
  0x4c   : > { %s2607_s24 = scalar_lea.hbm %s3265_s0, 2048  ;;  %p2608_p4 = scmp.lt.u32.totalorder %s2914_s9, %s3265_s0 }
  0x4d   : > { %p2605_p0 = pnand %p2604_p12, %p2603_p11  ;;  %p2609_p13 = scmp.lt.u32.totalorder %s2607_s24, %s2602_s14 }
  0x4e   : > { %p2611_p10 = scmp.lt.u32.totalorder %s2602_s14, %s2914_s9 }
  0x4f   : > { %p2606_p1 = pneg %p2605_p0  ;;  %p2610_p6 = por %p2609_p13, %p2608_p4 }
  0x51   : > { %p2612_p3 = por %p2611_p10, %p2610_p6 }
  0x53   : > { %p2613_p5 = pnand %p2612_p3, %p2606_p1 }
  0x55   : > { %2616 = shalt.err (!%p2613_p5)
}
  0x56   : > { %s2617_s15 = scalar_lea.vmem %s2922_s11, 1024  ;;  %s2724_s10 = smov [#allocation3]  }
  0x57   : > { %p2618_p9 = scmp.ne.s32.totalorder %s2922_s11, %s2617_s15  ;;  %s2622_s16 = sshll.u32 %s2724_s10, 4  ;;  %s2623_s16 = int_to_ptr.vmem [resolvable:$false] %s2622_s16 }
  0x58   : > { %s2624_s7 = scalar_lea.vmem %s2623_s16, 2048  ;;  %p2625_p7 = scmp.lt.s32.totalorder %s2922_s11, %s2623_s16 }
  0x59   : > { %p2620_p11 = pnand %p2618_p9, %p2604_p12  ;;  %p2626_p4 = scmp.lt.s32.totalorder %s2624_s7, %s2617_s15 }
  0x5b   : > { %p2621_p0 = pneg %p2620_p11  ;;  %p2627_p13 = por %p2626_p4, %p2625_p7 }
  0x5d   : > { %p2628_p6 = pnand %p2627_p13, %p2621_p0 }
  0x5f   : > { %2631 = shalt.err (!%p2628_p6)
}
  0x60   : > { %s3284_s14 = smov 128   ;;  %257 = sbr.rel (%p2815_p8) target bundleno = 1969 (0x7b1), region = 40 }
  0x61   : > { %2462 = dma.hbm_to_vmem [thread:$0]  (!%p2918_p2), %s2914_s9, 1024, %s2922_s11, %s2924_s12, %s3284_s14, %s3284_s14, %s2723_s6  }
  0x62   : > { %s2958_s24 = sand.u32 (!%p2815_p8), 1, %s2702_s19   ;;  %p3285_p7 = scmp.ne.s32.totalorder (!%p2815_p8), %s3278_s28, 0 }
  0x63   : > { %s1669_s27 = sshll.u32 (!%p2815_p8), %s2958_s24, 6  ;;  %s260_s15 = scalar_lea.sflag (!%p2815_p8), [#allocation4], %s2958_s24 }
  0x64   : > { %s2962_s10 = scalar_lea.vmem (!%p2815_p8), [#allocation3], %s1669_s27 }
  0x67   : > { %2685 = dma.done.wait (%p3285_p7), %s260_s15, 1024  }
  0x68   : > { %2687 = vsyncadd (%p3285_p7), %s260_s15, 4294966272  ;;  %p3286_p2 = scmp.ne.s32.totalorder %s3276_s26, 0 }
  0x6a   : > { %2689 = dma.done.wait (%p3286_p2), [#allocation7], 2304  }
  0x6b   : > { %2691 = vsyncadd (%p3286_p2), [#allocation7], 4294964992  ;;  %s2972_s30 = scalar_lea.vmem [#allocation9], %s1669_s27  ;;  %p1673_p8 = scmp.ne.s32.totalorder %s2710_s21, 0 }
  0x6c   : > { %v312_v0 = vld [vmem:[%s3269_s4] sm:$0xff] (!%p1673_p8) }
  0x6d   : > { %311 = sbr.rel (%p1673_p8) target bundleno = 116 (0x74), region = 56  ;;  %313 = vst [vmem:[#allocation2] sm:$0xff] (!%p1673_p8), %v312_v0 }
  0x74 PF: > { %v314_v1 = vld [vmem:[#allocation6] sm:$0xff]  ;;  %v315_v2 = vld [vmem:[#allocation6 + $0x8] sm:$0xff]  ;;  %v2725_v3 = vmov 0.0|0.0   ;;  %vm2726_vm0 = vmmov 0   ;;  %v2727_v5 = vmov 0.0   ;;  %v316_v6 = vld [vmem:[#allocation8] sm:$0xff] }
  0x75   : > { %2200 = vmatprep.subr.bf16.mxu0 %v2725_v3  ;;  %v2979_v4 = vpack.c.bf16 %v315_v2, %v314_v1  ;;  %1868 = vmatprep.mubr.msk.f32.mxu0 %vm2726_vm0, %v2727_v5  ;;  %v317_v7 = vld [vmem:[#allocation8 + $0x8] sm:$0xff]  ;;  %v334_v8 = vld [vmem:[%s2962_s10] sm:$0xff]  ;;  %vm341_vm1 = vcmask 130048   ;;  %v319_v11 = vld [vmem:[#allocation8 + $0x18] sm:$0xff]  ;;  %s1703_s9 = sshll.u32 %s2710_s21, 10  ;;  %s1539_s11 = sshll.u32 %s2972_s30, 4  ;;  %s3215_s11 = int_to_ptr.vmem [resolvable:$true] %s1539_s11 }
  0x76   : > { %2203 = vmatprep.subr.bf16.mxu1 %v2725_v3  ;;  %1875 = vmatprep.mubr.msk.f32.mxu1 %vm2726_vm0, %v2727_v5  ;;  %v2988_v9 = vpack.c.bf16 %v317_v7, %v316_v6  ;;  %v318_v10 = vld [vmem:[#allocation8 + $0x10] sm:$0xff]  ;;  %v1676_v12 = vld [vmem:[%s2962_s10 + $0x8] sm:$0xff]  ;;  %v320_v14 = vld [vmem:[#allocation8 + $0x20] sm:$0xff]  ;;  %s3213_s7 = scalar_lea.hbm %s3270_s5, %s1703_s9  ;;  %s1525_s14 = scalar_lea.sflag [#allocation5], %s2958_s24 }
  0x77   : > { %2202 = vmatpush3.bf16.msra.mxu0 %v2979_v4  ;;  %2205 = vmatpush3.bf16.msra.mxu1 %v2979_v4  ;;  %v2996_v13 = vpack.c.bf16 %v319_v11, %v318_v10  ;;  %v321_v15 = vld [vmem:[#allocation8 + $0x28] sm:$0xff]  ;;  %v1678_v16 = vld [vmem:[%s2962_s10 + $0x10] sm:$0xff]  ;;  %v322_v18 = vld [vmem:[#allocation8 + $0x30] sm:$0xff]  ;;  %s2632_s27 = scalar_lea.vmem %s3215_s11, 1024  ;;  %p3287_p1 = scmp.ne.s32.totalorder %s3282_s13, 0 }
  0x78   : > { %2206 = vmatprep.subr.bf16.mxu0 %v2725_v3  ;;  %2230 = vmatprep.subr.bf16.mxu1 %v2725_v3  ;;  %v3008_v17 = vpack.c.bf16 %v321_v15, %v320_v14  ;;  %v323_v19 = vld [vmem:[#allocation8 + $0x38] sm:$0xff]  ;;  %v324_v21 = vld [vmem:[#allocation8 + $0x40] sm:$0xff]  ;;  %v325_v22 = vld [vmem:[#allocation8 + $0x48] sm:$0xff]  ;;  %p2633_p12 = scmp.ne.s32.totalorder %s3215_s11, %s2632_s27  ;;  %s2728_s21 = smov [#allocation9]  }
  0x79   : > { %v3017_v20 = vpack.c.bf16 %v323_v19, %v322_v18  ;;  %v3023_v23 = vpack.c.bf16 %v325_v22, %v324_v21  ;;  %v326_v24 = vld [vmem:[#allocation8 + $0x50] sm:$0xff]  ;;  %v327_v25 = vld [vmem:[#allocation8 + $0x58] sm:$0xff]  ;;  %v328_v27 = vld [vmem:[#allocation8 + $0x60] sm:$0xff]  ;;  %s2636_s15 = sshll.u32 %s2728_s21, 4  ;;  %s2637_s15 = int_to_ptr.vmem [resolvable:$false] %s2636_s15 }
  0x7a   : > { %1869 = vmatmul.mubr.msk.f32.vlgmr.msra.gmra.mrb[0].mxu0 %vm341_vm1, %v334_v8  ;;  %1876 = vmatmul.mubr.msk.f32.vlgmr.msra.gmra.mrb[0].mxu1 %vm341_vm1, %v1676_v12  ;;  %v3029_v26 = vpack.c.bf16 %v327_v25, %v326_v24  ;;  %v329_v28 = vld [vmem:[#allocation8 + $0x68] sm:$0xff]  ;;  %v330_v30 = vld [vmem:[#allocation8 + $0x70] sm:$0xff]  ;;  %v331_v31 = vld [vmem:[#allocation8 + $0x78] sm:$0xff]  ;;  %p2634_p10 = pnand %p2633_p12, %p3287_p1  ;;  %p2639_p5 = scmp.lt.s32.totalorder %s3215_s11, %s2637_s15 }
  0x7b   : > { %2208 = vmatpush3.bf16.msra.mxu0 %v2988_v9  ;;  %1910 = vmatprep.mubr.msk.f32.mxu0 %vm2726_vm0, %v2727_v5  ;;  %v3035_v29 = vpack.c.bf16 %v329_v28, %v328_v27  ;;  %v3041_v32 = vpack.c.bf16 %v331_v31, %v330_v30  ;;  %v333_v33 = vld [vmem:[#allocation2] sm:$0xff]  ;;  %v1684_v40 = vld [vmem:[%s2962_s10 + $0x20] sm:$0xff]  ;;  %v1687_v49 = vld [vmem:[%s2962_s10 + $0x28] sm:$0xff] }
  0x7c   : > { %2209 = vmatprep.subr.bf16.mxu0 %v2725_v3  ;;  %2232 = vmatpush3.bf16.msra.mxu1 %v2979_v4  ;;  %v3059_v34 = vld [vmem:[%s3268_s3] ss:$0 sm:$0xff]  ;;  %v1690_v50 = vld [vmem:[%s2962_s10 + $0x30] sm:$0xff]  ;;  %p2635_p3 = pneg %p2634_p10 }
  0x7d   : > { %1917 = vmatprep.mubr.msk.f32.mxu1 %vm2726_vm0, %v2727_v5  ;;  %2233 = vmatprep.subr.bf16.mxu1 %v2725_v3  ;;  %v1681_v39 = vld [vmem:[%s2962_s10 + $0x18] sm:$0xff] }
  0x7e   : > { %v1693_v59 = vld [vmem:[%s2962_s10 + $0x38] sm:$0xff]  ;;  %s2638_s10 = scalar_lea.vmem %s2637_s15, 2048 }
  0x7f   : > { %2211 = vmatpush3.bf16.msra.mxu0 %v2996_v13  ;;  %1918 = vmatmul.mubr.msk.f32.vlgmr.msra.gmra.mrb[2].mxu1 %vm341_vm1, %v1678_v16  ;;  %p2640_p9 = scmp.lt.s32.totalorder %s2638_s10, %s2632_s27 }
  0x80   : > { %2212 = vmatprep.subr.bf16.mxu0 %v2725_v3  ;;  %2235 = vmatpush3.bf16.msra.mxu1 %v2988_v9 }
  0x81   : > { %1952 = vmatprep.mubr.msk.f32.mxu1 %vm2726_vm0, %v2727_v5  ;;  %2236 = vmatprep.subr.bf16.mxu1 %v2725_v3  ;;  %p2641_p11 = por %p2640_p9, %p2639_p5 }
  0x83   : > { %2214 = vmatpush3.bf16.msra.mxu0 %v3008_v17  ;;  %p2642_p0 = pnand %p2641_p11, %p2635_p3 }
  0x84   : > { %2215 = vmatprep.subr.bf16.mxu0 %v2725_v3  ;;  %2238 = vmatpush3.bf16.msra.mxu1 %v2996_v13 }
  0x85   : > { %2239 = vmatprep.subr.bf16.mxu1 %v2725_v3 }
  0x87   : > { %2217 = vmatpush3.bf16.msra.mxu0 %v3017_v20 }
  0x88   : > { %2218 = vmatprep.subr.bf16.mxu0 %v2725_v3  ;;  %2241 = vmatpush3.bf16.msra.mxu1 %v3008_v17 }
  0x89   : > { %2242 = vmatprep.subr.bf16.mxu1 %v2725_v3 }
  0x8b   : > { %2220 = vmatpush3.bf16.msra.mxu0 %v3023_v23 }
  0x8c   : > { %2221 = vmatprep.subr.bf16.mxu0 %v2725_v3  ;;  %2244 = vmatpush3.bf16.msra.mxu1 %v3017_v20 }
  0x8d   : > { %2245 = vmatprep.subr.bf16.mxu1 %v2725_v3 }
  0x8f   : > { %2223 = vmatpush3.bf16.msra.mxu0 %v3029_v26 }
  0x90   : > { %2224 = vmatprep.subr.bf16.mxu0 %v2725_v3  ;;  %2247 = vmatpush3.bf16.msra.mxu1 %v3023_v23 }
  0x91   : > { %2248 = vmatprep.subr.bf16.mxu1 %v2725_v3 }
  0x93   : > { %2226 = vmatpush3.bf16.msra.mxu0 %v3035_v29 }
  0x94   : > { %2227 = vmatprep.subr.bf16.mxu0 %v2725_v3  ;;  %2250 = vmatpush3.bf16.msra.mxu1 %v3029_v26 }
  0x95   : > { %2251 = vmatprep.subr.bf16.mxu1 %v2725_v3 }
  0x97   : > { %2229 = vmatpush3.bf16.msra.mxu0 %v3041_v32 }
  0x98   : > { %2257 = vmatprep.subr.bf16.mxu0 %v2725_v3  ;;  %2253 = vmatpush3.bf16.msra.mxu1 %v3035_v29 }
  0x99   : > { %2254 = vmatprep.subr.bf16.mxu1 %v2725_v3 }
  0x9a   : > { %1911 = vmatmul.mubr.f32.vlgmr.msra.gmra.mrb[0].mxu0 %v333_v33 }
  0x9b   : > { %2259 = vmatpush3.bf16.msra.mxu0 %v2979_v4  ;;  %1959 = vmatprep.mubr.msk.f32.mxu0 %vm2726_vm0, %v2727_v5 }
  0x9c   : > { %2284 = vmatprep.subr.bf16.mxu0 %v2725_v3  ;;  %2256 = vmatpush3.bf16.msra.mxu1 %v3041_v32 }
  0x9d   : > { %2260 = vmatprep.subr.bf16.mxu1 %v2725_v3 }
  0x9e   : > { %1960 = vmatmul.mubr.msk.f32.vlgmr.msra.gmra.mrb[2].mxu0 %vm341_vm1, %v1681_v39 }
  0x9f   : > { %2286 = vmatpush3.bf16.msra.mxu0 %v2979_v4  ;;  %2001 = vmatprep.mubr.msk.f32.mxu0 %vm2726_vm0, %v2727_v5 }
  0xa0   : > { %2287 = vmatprep.subr.bf16.mxu0 %v2725_v3 }
  0xa2   : > { %2002 = vmatmul.mubr.msk.f32.vlgmr.msra.gmra.mrb[4].mxu0 %vm341_vm1, %v1684_v40 }
  0xa3   : > { %2289 = vmatpush3.bf16.msra.mxu0 %v2988_v9  ;;  %2036 = vmatprep.mubr.msk.f32.mxu0 %vm2726_vm0, %v2727_v5 }
  0xa4   : > { %2290 = vmatprep.subr.bf16.mxu0 %v2725_v3 }
  0xa7   : > { %2292 = vmatpush3.bf16.msra.mxu0 %v2996_v13 }
  0xa8   : > { %2293 = vmatprep.subr.bf16.mxu0 %v2725_v3 }
  0xab   : > { %2295 = vmatpush3.bf16.msra.mxu0 %v3008_v17 }
  0xac   : > { %2296 = vmatprep.subr.bf16.mxu0 %v2725_v3 }
  0xaf   : > { %2298 = vmatpush3.bf16.msra.mxu0 %v3017_v20 }
  0xb0   : > { %2299 = vmatprep.subr.bf16.mxu0 %v2725_v3 }
  0xb3   : > { %2301 = vmatpush3.bf16.msra.mxu0 %v3023_v23 }
  0xb4   : > { %2302 = vmatprep.subr.bf16.mxu0 %v2725_v3 }
  0xb7   : > { %2304 = vmatpush3.bf16.msra.mxu0 %v3029_v26 }
  0xb8   : > { %2305 = vmatprep.subr.bf16.mxu0 %v2725_v3 }
  0xbb   : > { %2307 = vmatpush3.bf16.msra.mxu0 %v3035_v29 }
  0xbc   : > { %2308 = vmatprep.subr.bf16.mxu0 %v2725_v3 }
  0xbf   : > { %2310 = vmatpush3.bf16.msra.mxu0 %v3041_v32 }
  0xc0   : > { %2314 = vmatprep.subr.bf16.mxu0 %v2725_v3 }
 0x16d   : > { %v556_v35 = vpop.f32.mrb[0].mxu0 }
 0x16e   : > { %v2416_v36 = vadd.f32 %v3059_v34, %v556_v35  ;;  %v1912_v37 = vpop.f32.mrb[1].mxu0 }
 0x170   : > { %2530 = vtanh.f32 %v2416_v36 }
 0x17a   : > { %v2531_v38 = vpop.eup %2530 }
 0x17b   : > { %561 = vst [vmem:[%s2972_s30] sm:$0xff] %v2531_v38  ;;  %1953 = vmatmul.mubr.f32.vlgmr.msra.gmra.mrb[0].mxu1 %v2531_v38 }
 0x17c   : > { %2262 = vmatpush3.bf16.msra.mxu1 %v2988_v9  ;;  %1994 = vmatprep.mubr.msk.f32.mxu1 %vm2726_vm0, %v2727_v5 }
 0x17d   : > { %2263 = vmatprep.subr.bf16.mxu1 %v2725_v3 }
 0x180   : > { %2265 = vmatpush3.bf16.msra.mxu1 %v2996_v13 }
 0x181   : > { %2266 = vmatprep.subr.bf16.mxu1 %v2725_v3 }
 0x184   : > { %2268 = vmatpush3.bf16.msra.mxu1 %v3008_v17 }
 0x185   : > { %2269 = vmatprep.subr.bf16.mxu1 %v2725_v3 }
 0x188   : > { %2271 = vmatpush3.bf16.msra.mxu1 %v3017_v20 }
 0x189   : > { %2272 = vmatprep.subr.bf16.mxu1 %v2725_v3 }
 0x18c   : > { %2274 = vmatpush3.bf16.msra.mxu1 %v3023_v23 }
 0x18d   : > { %2275 = vmatprep.subr.bf16.mxu1 %v2725_v3 }
 0x190   : > { %2277 = vmatpush3.bf16.msra.mxu1 %v3029_v26 }
 0x191   : > { %2278 = vmatprep.subr.bf16.mxu1 %v2725_v3 }
 0x194   : > { %2280 = vmatpush3.bf16.msra.mxu1 %v3035_v29 }
 0x195   : > { %2281 = vmatprep.subr.bf16.mxu1 %v2725_v3 }
 0x198   : > { %2283 = vmatpush3.bf16.msra.mxu1 %v3041_v32 }
 0x199   : > { %2311 = vmatprep.subr.bf16.mxu1 %v2725_v3 }
 0x24e   : > { %v703_v41 = vpop.f32.mrb[0].mxu1 }
 0x24f   : > { %v2417_v42 = vadd.f32 %v3059_v34, %v703_v41  ;;  %v1954_v43 = vpop.f32.mrb[1].mxu1 }
 0x251   : > { %2532 = vtanh.f32 %v2417_v42 }
 0x25b   : > { %v2533_v44 = vpop.eup %2532 }
 0x25c   : > { %1680 = vst [vmem:[%s2972_s30 + $0x8] sm:$0xff] %v2533_v44  ;;  %1995 = vmatmul.mubr.f32.vlgmr.msra.gmra.mrb[2].mxu1 %v2533_v44 }
 0x25d   : > { %2313 = vmatpush3.bf16.msra.mxu1 %v2979_v4  ;;  %2043 = vmatprep.mubr.msk.f32.mxu1 %vm2726_vm0, %v2727_v5 }
 0x25e   : > { %2338 = vmatprep.subr.bf16.mxu1 %v2725_v3 }
 0x260   : > { %2044 = vmatmul.mubr.msk.f32.vlgmr.msra.gmra.mrb[4].mxu1 %vm341_vm1, %v1687_v49 }
 0x261   : > { %2340 = vmatpush3.bf16.msra.mxu1 %v2979_v4  ;;  %2085 = vmatprep.mubr.msk.f32.mxu1 %vm2726_vm0, %v2727_v5 }
 0x262   : > { %2341 = vmatprep.subr.bf16.mxu1 %v2725_v3 }
 0x264   : > { %2086 = vmatmul.mubr.msk.f32.vlgmr.msra.gmra.mrb[6].mxu1 %vm341_vm1, %v1690_v50 }
 0x265   : > { %2343 = vmatpush3.bf16.msra.mxu1 %v2988_v9  ;;  %2120 = vmatprep.mubr.msk.f32.mxu1 %vm2726_vm0, %v2727_v5 }
 0x266   : > { %2344 = vmatprep.subr.bf16.mxu1 %v2725_v3 }
 0x269   : > { %2346 = vmatpush3.bf16.msra.mxu1 %v2996_v13 }
 0x26a   : > { %2347 = vmatprep.subr.bf16.mxu1 %v2725_v3 }
 0x26d   : > { %2349 = vmatpush3.bf16.msra.mxu1 %v3008_v17 }
 0x26e   : > { %2350 = vmatprep.subr.bf16.mxu1 %v2725_v3 }
 0x271   : > { %2352 = vmatpush3.bf16.msra.mxu1 %v3017_v20 }
 0x272   : > { %2353 = vmatprep.subr.bf16.mxu1 %v2725_v3 }
 0x275   : > { %2355 = vmatpush3.bf16.msra.mxu1 %v3023_v23 }
 0x276   : > { %2356 = vmatprep.subr.bf16.mxu1 %v2725_v3 }
 0x279   : > { %2358 = vmatpush3.bf16.msra.mxu1 %v3029_v26 }
 0x27a   : > { %2359 = vmatprep.subr.bf16.mxu1 %v2725_v3 }
 0x27d   : > { %2361 = vmatpush3.bf16.msra.mxu1 %v3035_v29 }
 0x27e   : > { %2362 = vmatprep.subr.bf16.mxu1 %v2725_v3 }
 0x281   : > { %2364 = vmatpush3.bf16.msra.mxu1 %v3041_v32 }
 0x282   : > { %2368 = vmatprep.subr.bf16.mxu1 %v2725_v3 }
 0x32f   : > { %v851_v45 = vpop.f32.mrb[2].mxu1 }
 0x330   : > { %v2418_v46 = vadd.f32 %v3059_v34, %v851_v45  ;;  %v1996_v47 = vpop.f32.mrb[3].mxu1 }
 0x332   : > { %2534 = vtanh.f32 %v2418_v46 }
 0x33c   : > { %v2535_v48 = vpop.eup %2534 }
 0x33d   : > { %1683 = vst [vmem:[%s2972_s30 + $0x10] sm:$0xff] %v2535_v48  ;;  %2037 = vmatmul.mubr.f32.vlgmr.msra.gmra.mrb[2].mxu0 %v2535_v48 }
 0x33e   : > { %2316 = vmatpush3.bf16.msra.mxu0 %v2988_v9  ;;  %2078 = vmatprep.mubr.msk.f32.mxu0 %vm2726_vm0, %v2727_v5 }
 0x33f   : > { %2317 = vmatprep.subr.bf16.mxu0 %v2725_v3 }
 0x342   : > { %2319 = vmatpush3.bf16.msra.mxu0 %v2996_v13 }
 0x343   : > { %2320 = vmatprep.subr.bf16.mxu0 %v2725_v3 }
 0x346   : > { %2322 = vmatpush3.bf16.msra.mxu0 %v3008_v17 }
 0x347   : > { %2323 = vmatprep.subr.bf16.mxu0 %v2725_v3 }
 0x34a   : > { %2325 = vmatpush3.bf16.msra.mxu0 %v3017_v20 }
 0x34b   : > { %2326 = vmatprep.subr.bf16.mxu0 %v2725_v3 }
 0x34e   : > { %2328 = vmatpush3.bf16.msra.mxu0 %v3023_v23 }
 0x34f   : > { %2329 = vmatprep.subr.bf16.mxu0 %v2725_v3 }
 0x352   : > { %2331 = vmatpush3.bf16.msra.mxu0 %v3029_v26 }
 0x353   : > { %2332 = vmatprep.subr.bf16.mxu0 %v2725_v3 }
 0x356   : > { %2334 = vmatpush3.bf16.msra.mxu0 %v3035_v29 }
 0x357   : > { %2335 = vmatprep.subr.bf16.mxu0 %v2725_v3 }
 0x35a   : > { %2337 = vmatpush3.bf16.msra.mxu0 %v3041_v32 }
 0x35b   : > { %2365 = vmatprep.subr.bf16.mxu0 %v2725_v3 }
 0x410   : > { %v999_v51 = vpop.f32.mrb[2].mxu0 }
 0x411   : > { %v2419_v52 = vadd.f32 %v3059_v34, %v999_v51  ;;  %v2038_v53 = vpop.f32.mrb[3].mxu0 }
 0x413   : > { %2536 = vtanh.f32 %v2419_v52 }
 0x41d   : > { %v2537_v54 = vpop.eup %2536 }
 0x41e   : > { %1686 = vst [vmem:[%s2972_s30 + $0x18] sm:$0xff] %v2537_v54  ;;  %2079 = vmatmul.mubr.f32.vlgmr.msra.gmra.mrb[4].mxu0 %v2537_v54 }
 0x41f   : > { %2367 = vmatpush3.bf16.msra.mxu0 %v2979_v4  ;;  %2127 = vmatprep.mubr.msk.f32.mxu0 %vm2726_vm0, %v2727_v5 }
 0x420   : > { %2392 = vmatprep.subr.bf16.mxu0 %v2725_v3 }
 0x422   : > { %2128 = vmatmul.mubr.msk.f32.vlgmr.msra.gmra.mrb[6].mxu0 %vm341_vm1, %v1693_v59 }
 0x423   : > { %2394 = vmatpush3.bf16.msra.mxu0 %v2988_v9  ;;  %2197 = vmatprep.mubr.msk.f32.mxu0 %vm2726_vm0, %v2727_v5 }
 0x424   : > { %2395 = vmatprep.subr.bf16.mxu0 %v2725_v3 }
 0x427   : > { %2397 = vmatpush3.bf16.msra.mxu0 %v2996_v13 }
 0x428   : > { %2398 = vmatprep.subr.bf16.mxu0 %v2725_v3 }
 0x42b   : > { %2400 = vmatpush3.bf16.msra.mxu0 %v3008_v17 }
 0x42c   : > { %2401 = vmatprep.subr.bf16.mxu0 %v2725_v3 }
 0x42f   : > { %2403 = vmatpush3.bf16.msra.mxu0 %v3017_v20 }
 0x430   : > { %2404 = vmatprep.subr.bf16.mxu0 %v2725_v3 }
 0x433   : > { %2406 = vmatpush3.bf16.msra.mxu0 %v3023_v23 }
 0x434   : > { %2407 = vmatprep.subr.bf16.mxu0 %v2725_v3 }
 0x437   : > { %2409 = vmatpush3.bf16.msra.mxu0 %v3029_v26 }
 0x438   : > { %2410 = vmatprep.subr.bf16.mxu0 %v2725_v3 }
 0x43b   : > { %2412 = vmatpush3.bf16.msra.mxu0 %v3035_v29 }
 0x43c   : > { %2413 = vmatprep.subr.bf16.mxu0 %v2725_v3 }
 0x43f   : > { %2415 = vmatpush3.bf16.msra.mxu0 %v3041_v32 }
 0x4f1   : > { %v1147_v55 = vpop.f32.mrb[4].mxu0 }
 0x4f2   : > { %v2420_v56 = vadd.f32 %v3059_v34, %v1147_v55  ;;  %v2080_v57 = vpop.f32.mrb[5].mxu0 }
 0x4f4   : > { %2538 = vtanh.f32 %v2420_v56 }
 0x4fe   : > { %v2539_v58 = vpop.eup %2538 }
 0x4ff   : > { %1689 = vst [vmem:[%s2972_s30 + $0x20] sm:$0xff] %v2539_v58  ;;  %2121 = vmatmul.mubr.f32.vlgmr.msra.gmra.mrb[4].mxu1 %v2539_v58 }
 0x500   : > { %2370 = vmatpush3.bf16.msra.mxu1 %v2988_v9  ;;  %2162 = vmatprep.mubr.msk.f32.mxu1 %vm2726_vm0, %v2727_v5 }
 0x501   : > { %2371 = vmatprep.subr.bf16.mxu1 %v2725_v3 }
 0x504   : > { %2373 = vmatpush3.bf16.msra.mxu1 %v2996_v13 }
 0x505   : > { %2374 = vmatprep.subr.bf16.mxu1 %v2725_v3 }
 0x508   : > { %2376 = vmatpush3.bf16.msra.mxu1 %v3008_v17 }
 0x509   : > { %2377 = vmatprep.subr.bf16.mxu1 %v2725_v3 }
 0x50c   : > { %2379 = vmatpush3.bf16.msra.mxu1 %v3017_v20 }
 0x50d   : > { %2380 = vmatprep.subr.bf16.mxu1 %v2725_v3 }
 0x510   : > { %2382 = vmatpush3.bf16.msra.mxu1 %v3023_v23 }
 0x511   : > { %2383 = vmatprep.subr.bf16.mxu1 %v2725_v3 }
 0x514   : > { %2385 = vmatpush3.bf16.msra.mxu1 %v3029_v26 }
 0x515   : > { %2386 = vmatprep.subr.bf16.mxu1 %v2725_v3 }
 0x518   : > { %2388 = vmatpush3.bf16.msra.mxu1 %v3035_v29 }
 0x519   : > { %2389 = vmatprep.subr.bf16.mxu1 %v2725_v3 }
 0x51c   : > { %2391 = vmatpush3.bf16.msra.mxu1 %v3041_v32 }
 0x5d2   : > { %v1295_v60 = vpop.f32.mrb[4].mxu1 }
 0x5d3   : > { %v2421_v61 = vadd.f32 %v3059_v34, %v1295_v60  ;;  %v2122_v62 = vpop.f32.mrb[5].mxu1 }
 0x5d5   : > { %2540 = vtanh.f32 %v2421_v61 }
 0x5df   : > { %v2541_v63 = vpop.eup %2540 }
 0x5e0   : > { %1692 = vst [vmem:[%s2972_s30 + $0x28] sm:$0xff] %v2541_v63  ;;  %2163 = vmatmul.mubr.f32.vlgmr.msra.gmra.mrb[6].mxu1 %v2541_v63 }
 0x6b3   : > { %v1443_v0 = vpop.f32.mrb[6].mxu1 }
 0x6b4   : > { %v2422_v1 = vadd.f32 %v3059_v34, %v1443_v0  ;;  %v2164_v2 = vpop.f32.mrb[7].mxu1 }
 0x6b6   : > { %2542 = vtanh.f32 %v2422_v1 }
 0x6c0   : > { %v2543_v3 = vpop.eup %2542 }
 0x6c1   : > { %1695 = vst [vmem:[%s2972_s30 + $0x30] sm:$0xff] %v2543_v3  ;;  %2198 = vmatmul.mubr.f32.vlgmr.msra.gmra.mrb[6].mxu0 %v2543_v3 }
 0x794   : > { %v1516_v4 = vpop.f32.mrb[6].mxu0 }
 0x795   : > { %v2423_v5 = vadd.f32 %v3059_v34, %v1516_v4  ;;  %v2199_v6 = vpop.f32.mrb[7].mxu0 }
 0x797   : > { %2544 = vtanh.f32 %v2423_v5 }
 0x7a1   : > { %v2545_v7 = vpop.eup %2544 }
 0x7a2   : > { %1696 = vst [vmem:[%s2972_s30 + $0x38] sm:$0xff] %v2545_v7  ;;  %1523 = vst [vmem:[#allocation2] sm:$0xff] %v2545_v7 }
 0x7a3   : > { %2645 = shalt.err (!%p2642_p0)
}
 0x7a4   : > { %s2646_s30 = scalar_lea.hbm %s3213_s7, 1024  ;;  %s2650_s26 = scalar_lea.hbm %s3270_s5, 2048 }
 0x7a5   : > { %p2647_p4 = scmp.ne.s32.totalorder %s3213_s7, %s2646_s30  ;;  %p2651_p7 = scmp.lt.u32.totalorder %s3213_s7, %s3270_s5 }
 0x7a6   : > { %p2652_p2 = scmp.lt.u32.totalorder %s2650_s26, %s2646_s30  ;;  %p2654_p12 = scmp.lt.u32.totalorder %s2646_s30, %s3213_s7 }
 0x7a7   : > { %p2648_p13 = pnand %p2647_p4, %p3287_p1 }
 0x7a8   : > { %p2653_p8 = por %p2652_p2, %p2651_p7 }
 0x7a9   : > { %p2649_p6 = pneg %p2648_p13 }
 0x7aa   : > { %p2655_p10 = por %p2654_p12, %p2653_p8 }
 0x7ac   : > { %p2656_p3 = pnand %p2655_p10, %p2649_p6 }
 0x7ae   : > { %2659 = shalt.err (!%p2656_p3)
}
 0x7af   : > { %s2729_s12 = smov 128   ;;  %s2730_s16 = smov 8  }
 0x7b0   : > { %2450 = dma.vmem_to_hbm [thread:$0]  (%p3287_p1), %s3215_s11, 1024, %s3213_s7, %s1525_s14, %s2729_s12, %s2729_s12, %s2730_s16  }
 0x7b1 PF: > { %s1554_s27 = sand.u32 1, %s2698_s18   ;;  %p3288_p5 = scmp.ne.s32.totalorder %s3279_s29, 0 }
 0x7b2   : > { %p3289_p9 = scmp.ge.s32.totalorder %s2718_s23, 2  ;;  %s1555_s21 = scalar_lea.sflag [#allocation5], %s1554_s27 }
 0x7b4   : > { %p2464_p11 = pnand %p3289_p9, %p3288_p5 }
 0x7b6   : > { %2693 = dma.done.wait (!%p2464_p11), %s1555_s21, 1024  }
 0x7b7   : > { %2695 = vsyncadd (!%p2464_p11), %s1555_s21, 4294966272  ;;  %s22_s23 = sadd.s32 1, %s2718_s23   ;;  %s3290_s18 = smov %s2702_s19 }
 0x7b8   : > { %p19_p0 = scmp.ge.s32.totalorder %s22_s23, 4   ;;  %s3291_s19 = smov %s2706_s20 }
 0x7b9   : > { %s3292_s20 = smov %s2909_s17  ;;  %s3293_s21 = smov %s2714_s22 }
 0x7ba   : > { %s3294_s22 = smov %s3296_s8  ;;  %21 = sbr.rel (!%p19_p0) target bundleno = 7 (0x7), region = 114 }
 0x7c1   :  { %1560 = vsyncpa [#allocation4], 1 }
 0x7c2   :  { %1562 = vsyncpa [#allocation4 + $0x1], 1 }
 0x7c3   :  { %1563 = vsyncpa [#allocation7], 1 }
 0x7c4   :  { %1564 = vsyncpa [#allocation5], 1 }
 0x7c5   :  { %1566 = vsyncpa [#allocation5 + $0x1], 1 }

// kernel: tpu_custom_call.1
= control target key start
LH: loop header
LB: loop body
LE: loop exit
PB: predicated region body
PF: predicated region fallthrough
CT: control target
= control target key end

     0   :  { %10 = vsyncpa [#allocation4], 0  ;;  %s3265_s0 = inlined_call_operand.hbm [shape: f32[16,8,16], index: 0, kind: input, shape index: {}]   ;;  %s3266_s1 = inlined_call_operand.hbm [shape: f32[16,128], index: 1, kind: input, shape index: {}]   ;;  %s3267_s2 = inlined_call_operand.hbm [shape: f32[128,128], index: 2, kind: input, shape index: {}]   ;;  %s3268_s3 = inlined_call_operand.vmem [shape: f32[1,128], index: 3, kind: input, shape index: {}]   ;;  %s3269_s4 = inlined_call_operand.vmem [shape: f32[8,128], index: 4, kind: input, shape index: {}]   ;;  %s3270_s5 = inlined_call_operand.hbm [shape: f32[16,8,128], index: 5, kind: output, shape index: {}]  }
   0x1   :  { %12 = vsyncpa [#allocation4 + $0x1], 0 }
   0x2   :  { %13 = vsyncpa [#allocation7], 0 }
   0x3   :  { %14 = vsyncpa [#allocation5], 0 }
   0x4   :  { %16 = vsyncpa [#allocation5 + $0x1], 0  ;;  %s2761_s18 = smov 0   ;;  %s2763_s19 = smov 0  }
   0x5   :  { %s2765_s20 = smov 0   ;;  %s2767_s21 = smov 0  }
   0x6   :  { %s2769_s22 = smov 0   ;;  %s2771_s23 = smov 0  }
   0x7 LB: > { %s1658_s24 = sadd.s32 4294967295, %s2718_s23   ;;  %s1659_s25 = sadd.s32 4294967294, %s2718_s23   ;;  %s2718_s23 = sphi %s2771_s23, %s22_s23   ;;  %s2714_s22 = sphi %s2769_s22, %s3294_s22   ;;  %s2710_s21 = sphi %s2767_s21, %s3293_s21   ;;  %s2706_s20 = sphi %s2765_s20, %s3292_s20   ;;  %s2702_s19 = sphi %s2763_s19, %s3291_s19   ;;  %s2698_s18 = sphi %s2761_s18, %s3290_s18  }
   0x8   : > { %p56_p0 = scmp.ne.s32.totalorder %s2702_s19, %s2698_s18  ;;  %p2795_p1 = scmp.eq.s32.totalorder %s1658_s24, 0 }
   0x9   : > { %p2799_p2 = scmp.eq.s32.totalorder %s1658_s24, 1  ;;  %p177_p3 = scmp.eq.s32.totalorder %s1659_s25, 1 }
   0xa   : > { %s3276_s26 = scalar_select %p2795_p1, 1, 0 }
   0xb   : > { %p2805_p4 = por %p2795_p1, %p56_p0  ;;  %p1660_p5 = scmp.ge.s32.totalorder %s2718_s23, 1 }
   0xc   : > { %p2810_p6 = por %p177_p3, %p56_p0  ;;  %p184_p7 = scmp.lt.s32.totalorder %s2718_s23, 3 }
   0xd   : > { %s3278_s28 = scalar_select %p2805_p4, 1, 0 }
   0xe   : > { %s3279_s29 = scalar_select %p2810_p6, 1, 0 }
   0xf   : > { %p2815_p8 = pnand %p1660_p5, %p184_p7  ;;  %s2720_s6 = smov [#allocation6]  }
  0x10   : > { %s196_s7 = sshll.u32 %s2720_s6, 4  ;;  %s2721_s9 = smov [#allocation8]   ;;  %s2819_s7 = int_to_ptr.vmem [resolvable:$true] %s196_s7 }
  0x11   : > { %p2452_p9 = pneg %p2815_p8  ;;  %s209_s10 = sshll.u32 %s2721_s9, 4  ;;  %s2830_s10 = int_to_ptr.vmem [resolvable:$true] %s209_s10 }
  0x12   : > { %s2546_s13 = scalar_lea.hbm %s3266_s1, 256 }
  0x13   : > { %p2826_p11 = pnand %p2452_p9, %p2795_p1  ;;  %p2547_p12 = scmp.ne.s32.totalorder %s3266_s1, %s2546_s13 }
  0x14   : > { %p2553_p5 = scmp.lt.u32.totalorder %s2546_s13, %s3266_s1 }
  0x15   : > { %p2548_p13 = pneg %p2826_p11 }
  0x17   : > { %p2549_p0 = pnand %p2548_p13, %p2547_p12 }
  0x19   : > { %p2550_p3 = pneg %p2549_p0 }
  0x1b   : > { %p2555_p7 = pnand %p2553_p5, %p2550_p3 }
  0x1d   : > { %2558 = shalt.err (!%p2555_p7)
}
  0x1e   : > { %s2559_s24 = scalar_lea.vmem %s2819_s7, 256  ;;  %p2567_p1 = scmp.lt.s32.totalorder %s2819_s7, %s2819_s7 }
  0x1f   : > { %p2560_p9 = scmp.ne.s32.totalorder %s2819_s7, %s2559_s24  ;;  %p2568_p12 = scmp.lt.s32.totalorder %s2559_s24, %s2559_s24 }
  0x21   : > { %p2562_p10 = pnand %p2560_p9, %p2548_p13  ;;  %p2569_p0 = por %p2568_p12, %p2567_p1 }
  0x23   : > { %p2563_p6 = pneg %p2562_p10 }
  0x25   : > { %p2570_p4 = pnand %p2569_p0, %p2563_p6 }
  0x27   : > { %2573 = shalt.err (!%p2570_p4)
}
  0x28   : > { %s3274_s25 = smov 128   ;;  %s2723_s6 = smov 8  }
  0x29   : > { %2455 = dma.hbm_to_vmem [thread:$0]  (!%p2826_p11), %s3266_s1, 256, %s2819_s7, [#allocation7], %s3274_s25, %s3274_s25, %s2723_s6  }
  0x2a   : > { %s2574_s14 = scalar_lea.hbm %s3267_s2, 2048 }
  0x2b   : > { %p2575_p1 = scmp.ne.s32.totalorder %s3267_s2, %s2574_s14  ;;  %p2581_p10 = scmp.lt.u32.totalorder %s2574_s14, %s3267_s2 }
  0x2d   : > { %p2577_p4 = pnand %p2575_p1, %p2548_p13 }
  0x2f   : > { %p2578_p6 = pneg %p2577_p4 }
  0x31   : > { %p2583_p3 = pnand %p2581_p10, %p2578_p6 }
  0x33   : > { %2586 = shalt.err (!%p2583_p3)
}
  0x34   : > { %s2587_s7 = scalar_lea.vmem %s2830_s10, 2048  ;;  %p2595_p12 = scmp.lt.s32.totalorder %s2830_s10, %s2830_s10 }
  0x35   : > { %p2588_p5 = scmp.ne.s32.totalorder %s2830_s10, %s2587_s7  ;;  %p2596_p0 = scmp.lt.s32.totalorder %s2587_s7, %s2587_s7 }
  0x37   : > { %p2590_p7 = pnand %p2588_p5, %p2548_p13  ;;  %p2597_p1 = por %p2596_p0, %p2595_p12 }
  0x39   : > { %p2591_p9 = pneg %p2590_p7 }
  0x3b   : > { %p2598_p4 = pnand %p2597_p1, %p2591_p9 }
  0x3d   : > { %2601 = shalt.err (!%p2598_p4)
}
  0x3e   : > { %2458 = dma.hbm_to_vmem [thread:$0]  (!%p2826_p11), %s3267_s2, 2048, %s2830_s10, [#allocation7], %s3274_s25, %s3274_s25, %s2723_s6  }
  0x3f   : > { %s31_s8 = sadd.s32 1, %s2714_s22  ;;  %s43_s12 = sadd.s32 1, %s2706_s20 }
  0x40   : > { %p32_p13 = scmp.ge.s32.totalorder %s31_s8, 2  ;;  %p50_p6 = scmp.ne.s32.totalorder %s2706_s20, %s2702_s19 }
  0x41   : > { %p51_p10 = scmp.eq.s32.totalorder %s2718_s23, 0  ;;  %p2469_p3 = scmp.lt.s32.totalorder %s2718_s23, 2 }
  0x42   : > { %s3296_s8 = smov (%p32_p13, %s31_s8), 0  ;;  %p2900_p7 = por %p2799_p2, %p50_p6 }
  0x43   : > { %p52_p5 = por %p51_p10, %p50_p6  ;;  %s38_s14 = ssub.s32 %s2714_s22, %s3296_s8 }
  0x44   : > { %s3282_s13 = scalar_select %p2900_p7, 1, 0 }
  0x45   : > { %s233_s15 = sand.u32 1, %s2706_s20   ;;  %p41_p9 = scmp.eq.s32.totalorder %s38_s14, 0 }
  0x46   : > { %s1665_s10 = sshll.u32 %s233_s15, 6  ;;  %s1702_s16 = sshll.u32 %s2714_s22, 10 }
  0x47   : > { %s2909_s17 = scalar_select %p41_p9, %s2706_s20, %s43_s12  }
  0x48   : > { %s2914_s9 = scalar_lea.hbm %s3265_s0, %s1702_s16  ;;  %s237_s27 = scalar_lea.vmem [#allocation3], %s1665_s10 }
  0x49   : > { %s245_s11 = sshll.u32 %s237_s27, 4  ;;  %p2918_p2 = pnand %p2469_p3, %p52_p5  ;;  %s2922_s11 = int_to_ptr.vmem [resolvable:$true] %s245_s11 }
  0x4a   : > { %s2924_s12 = scalar_lea.sflag [#allocation4], %s233_s15  ;;  %s2602_s14 = scalar_lea.hbm %s2914_s9, 1024 }
  0x4b   : > { %p2603_p11 = scmp.ne.s32.totalorder %s2914_s9, %s2602_s14  ;;  %p2604_p12 = pneg %p2918_p2 }
  0x4c   : > { %s2607_s24 = scalar_lea.hbm %s3265_s0, 2048  ;;  %p2608_p4 = scmp.lt.u32.totalorder %s2914_s9, %s3265_s0 }
  0x4d   : > { %p2605_p0 = pnand %p2604_p12, %p2603_p11  ;;  %p2609_p13 = scmp.lt.u32.totalorder %s2607_s24, %s2602_s14 }
  0x4e   : > { %p2611_p10 = scmp.lt.u32.totalorder %s2602_s14, %s2914_s9 }
  0x4f   : > { %p2606_p1 = pneg %p2605_p0  ;;  %p2610_p6 = por %p2609_p13, %p2608_p4 }
  0x51   : > { %p2612_p3 = por %p2611_p10, %p2610_p6 }
  0x53   : > { %p2613_p5 = pnand %p2612_p3, %p2606_p1 }
  0x55   : > { %2616 = shalt.err (!%p2613_p5)
}
  0x56   : > { %s2617_s15 = scalar_lea.vmem %s2922_s11, 1024  ;;  %s2724_s10 = smov [#allocation3]  }
  0x57   : > { %p2618_p9 = scmp.ne.s32.totalorder %s2922_s11, %s2617_s15  ;;  %s2622_s16 = sshll.u32 %s2724_s10, 4  ;;  %s2623_s16 = int_to_ptr.vmem [resolvable:$false] %s2622_s16 }
  0x58   : > { %s2624_s7 = scalar_lea.vmem %s2623_s16, 2048  ;;  %p2625_p7 = scmp.lt.s32.totalorder %s2922_s11, %s2623_s16 }
  0x59   : > { %p2620_p11 = pnand %p2618_p9, %p2604_p12  ;;  %p2626_p4 = scmp.lt.s32.totalorder %s2624_s7, %s2617_s15 }
  0x5b   : > { %p2621_p0 = pneg %p2620_p11  ;;  %p2627_p13 = por %p2626_p4, %p2625_p7 }
  0x5d   : > { %p2628_p6 = pnand %p2627_p13, %p2621_p0 }
  0x5f   : > { %2631 = shalt.err (!%p2628_p6)
}
  0x60   : > { %s3284_s14 = smov 128   ;;  %257 = sbr.rel (%p2815_p8) target bundleno = 1969 (0x7b1), region = 40 }
  0x61   : > { %2462 = dma.hbm_to_vmem [thread:$0]  (!%p2918_p2), %s2914_s9, 1024, %s2922_s11, %s2924_s12, %s3284_s14, %s3284_s14, %s2723_s6  }
  0x62   : > { %s2958_s24 = sand.u32 (!%p2815_p8), 1, %s2702_s19   ;;  %p3285_p7 = scmp.ne.s32.totalorder (!%p2815_p8), %s3278_s28, 0 }
  0x63   : > { %s1669_s27 = sshll.u32 (!%p2815_p8), %s2958_s24, 6  ;;  %s260_s15 = scalar_lea.sflag (!%p2815_p8), [#allocation4], %s2958_s24 }
  0x64   : > { %s2962_s10 = scalar_lea.vmem (!%p2815_p8), [#allocation3], %s1669_s27 }
  0x67   : > { %2685 = dma.done.wait (%p3285_p7), %s260_s15, 1024  }
  0x68   : > { %2687 = vsyncadd (%p3285_p7), %s260_s15, 4294966272  ;;  %p3286_p2 = scmp.ne.s32.totalorder %s3276_s26, 0 }
  0x6a   : > { %2689 = dma.done.wait (%p3286_p2), [#allocation7], 2304  }
  0x6b   : > { %2691 = vsyncadd (%p3286_p2), [#allocation7], 4294964992  ;;  %s2972_s30 = scalar_lea.vmem [#allocation9], %s1669_s27  ;;  %p1673_p8 = scmp.ne.s32.totalorder %s2710_s21, 0 }
  0x6c   : > { %v312_v0 = vld [vmem:[%s3269_s4] sm:$0xff] (!%p1673_p8) }
  0x6d   : > { %311 = sbr.rel (%p1673_p8) target bundleno = 116 (0x74), region = 56  ;;  %313 = vst [vmem:[#allocation2] sm:$0xff] (!%p1673_p8), %v312_v0 }
  0x74 PF: > { %v314_v1 = vld [vmem:[#allocation6] sm:$0xff]  ;;  %v315_v2 = vld [vmem:[#allocation6 + $0x8] sm:$0xff]  ;;  %v2725_v3 = vmov 0.0|0.0   ;;  %vm2726_vm0 = vmmov 0   ;;  %v2727_v5 = vmov 0.0   ;;  %v316_v6 = vld [vmem:[#allocation8] sm:$0xff] }
  0x75   : > { %2200 = vmatprep.subr.bf16.mxu0 %v2725_v3  ;;  %v2979_v4 = vpack.c.bf16 %v315_v2, %v314_v1  ;;  %1868 = vmatprep.mubr.msk.f32.mxu0 %vm2726_vm0, %v2727_v5  ;;  %v317_v7 = vld [vmem:[#allocation8 + $0x8] sm:$0xff]  ;;  %v334_v8 = vld [vmem:[%s2962_s10] sm:$0xff]  ;;  %vm341_vm1 = vcmask 130048   ;;  %v319_v11 = vld [vmem:[#allocation8 + $0x18] sm:$0xff]  ;;  %s1703_s9 = sshll.u32 %s2710_s21, 10  ;;  %s1539_s11 = sshll.u32 %s2972_s30, 4  ;;  %s3215_s11 = int_to_ptr.vmem [resolvable:$true] %s1539_s11 }
  0x76   : > { %2203 = vmatprep.subr.bf16.mxu1 %v2725_v3  ;;  %1875 = vmatprep.mubr.msk.f32.mxu1 %vm2726_vm0, %v2727_v5  ;;  %v2988_v9 = vpack.c.bf16 %v317_v7, %v316_v6  ;;  %v318_v10 = vld [vmem:[#allocation8 + $0x10] sm:$0xff]  ;;  %v1676_v12 = vld [vmem:[%s2962_s10 + $0x8] sm:$0xff]  ;;  %v320_v14 = vld [vmem:[#allocation8 + $0x20] sm:$0xff]  ;;  %s3213_s7 = scalar_lea.hbm %s3270_s5, %s1703_s9  ;;  %s1525_s14 = scalar_lea.sflag [#allocation5], %s2958_s24 }
  0x77   : > { %2202 = vmatpush3.bf16.msra.mxu0 %v2979_v4  ;;  %2205 = vmatpush3.bf16.msra.mxu1 %v2979_v4  ;;  %v2996_v13 = vpack.c.bf16 %v319_v11, %v318_v10  ;;  %v321_v15 = vld [vmem:[#allocation8 + $0x28] sm:$0xff]  ;;  %v1678_v16 = vld [vmem:[%s2962_s10 + $0x10] sm:$0xff]  ;;  %v322_v18 = vld [vmem:[#allocation8 + $0x30] sm:$0xff]  ;;  %s2632_s27 = scalar_lea.vmem %s3215_s11, 1024  ;;  %p3287_p1 = scmp.ne.s32.totalorder %s3282_s13, 0 }
  0x78   : > { %2206 = vmatprep.subr.bf16.mxu0 %v2725_v3  ;;  %2230 = vmatprep.subr.bf16.mxu1 %v2725_v3  ;;  %v3008_v17 = vpack.c.bf16 %v321_v15, %v320_v14  ;;  %v323_v19 = vld [vmem:[#allocation8 + $0x38] sm:$0xff]  ;;  %v324_v21 = vld [vmem:[#allocation8 + $0x40] sm:$0xff]  ;;  %v325_v22 = vld [vmem:[#allocation8 + $0x48] sm:$0xff]  ;;  %p2633_p12 = scmp.ne.s32.totalorder %s3215_s11, %s2632_s27  ;;  %s2728_s21 = smov [#allocation9]  }
  0x79   : > { %v3017_v20 = vpack.c.bf16 %v323_v19, %v322_v18  ;;  %v3023_v23 = vpack.c.bf16 %v325_v22, %v324_v21  ;;  %v326_v24 = vld [vmem:[#allocation8 + $0x50] sm:$0xff]  ;;  %v327_v25 = vld [vmem:[#allocation8 + $0x58] sm:$0xff]  ;;  %v328_v27 = vld [vmem:[#allocation8 + $0x60] sm:$0xff]  ;;  %s2636_s15 = sshll.u32 %s2728_s21, 4  ;;  %s2637_s15 = int_to_ptr.vmem [resolvable:$false] %s2636_s15 }
  0x7a   : > { %1869 = vmatmul.mubr.msk.f32.vlgmr.msra.gmra.mrb[0].mxu0 %vm341_vm1, %v334_v8  ;;  %1876 = vmatmul.mubr.msk.f32.vlgmr.msra.gmra.mrb[0].mxu1 %vm341_vm1, %v1676_v12  ;;  %v3029_v26 = vpack.c.bf16 %v327_v25, %v326_v24  ;;  %v329_v28 = vld [vmem:[#allocation8 + $0x68] sm:$0xff]  ;;  %v330_v30 = vld [vmem:[#allocation8 + $0x70] sm:$0xff]  ;;  %v331_v31 = vld [vmem:[#allocation8 + $0x78] sm:$0xff]  ;;  %p2634_p10 = pnand %p2633_p12, %p3287_p1  ;;  %p2639_p5 = scmp.lt.s32.totalorder %s3215_s11, %s2637_s15 }
  0x7b   : > { %2208 = vmatpush3.bf16.msra.mxu0 %v2988_v9  ;;  %1910 = vmatprep.mubr.msk.f32.mxu0 %vm2726_vm0, %v2727_v5  ;;  %v3035_v29 = vpack.c.bf16 %v329_v28, %v328_v27  ;;  %v3041_v32 = vpack.c.bf16 %v331_v31, %v330_v30  ;;  %v333_v33 = vld [vmem:[#allocation2] sm:$0xff]  ;;  %v1684_v40 = vld [vmem:[%s2962_s10 + $0x20] sm:$0xff]  ;;  %v1687_v49 = vld [vmem:[%s2962_s10 + $0x28] sm:$0xff] }
  0x7c   : > { %2209 = vmatprep.subr.bf16.mxu0 %v2725_v3  ;;  %2232 = vmatpush3.bf16.msra.mxu1 %v2979_v4  ;;  %v3059_v34 = vld [vmem:[%s3268_s3] ss:$0 sm:$0xff]  ;;  %v1690_v50 = vld [vmem:[%s2962_s10 + $0x30] sm:$0xff]  ;;  %p2635_p3 = pneg %p2634_p10 }
  0x7d   : > { %1917 = vmatprep.mubr.msk.f32.mxu1 %vm2726_vm0, %v2727_v5  ;;  %2233 = vmatprep.subr.bf16.mxu1 %v2725_v3  ;;  %v1681_v39 = vld [vmem:[%s2962_s10 + $0x18] sm:$0xff] }
  0x7e   : > { %v1693_v59 = vld [vmem:[%s2962_s10 + $0x38] sm:$0xff]  ;;  %s2638_s10 = scalar_lea.vmem %s2637_s15, 2048 }
  0x7f   : > { %2211 = vmatpush3.bf16.msra.mxu0 %v2996_v13  ;;  %1918 = vmatmul.mubr.msk.f32.vlgmr.msra.gmra.mrb[2].mxu1 %vm341_vm1, %v1678_v16  ;;  %p2640_p9 = scmp.lt.s32.totalorder %s2638_s10, %s2632_s27 }
  0x80   : > { %2212 = vmatprep.subr.bf16.mxu0 %v2725_v3  ;;  %2235 = vmatpush3.bf16.msra.mxu1 %v2988_v9 }
  0x81   : > { %1952 = vmatprep.mubr.msk.f32.mxu1 %vm2726_vm0, %v2727_v5  ;;  %2236 = vmatprep.subr.bf16.mxu1 %v2725_v3  ;;  %p2641_p11 = por %p2640_p9, %p2639_p5 }
  0x83   : > { %2214 = vmatpush3.bf16.msra.mxu0 %v3008_v17  ;;  %p2642_p0 = pnand %p2641_p11, %p2635_p3 }
  0x84   : > { %2215 = vmatprep.subr.bf16.mxu0 %v2725_v3  ;;  %2238 = vmatpush3.bf16.msra.mxu1 %v2996_v13 }
  0x85   : > { %2239 = vmatprep.subr.bf16.mxu1 %v2725_v3 }
  0x87   : > { %2217 = vmatpush3.bf16.msra.mxu0 %v3017_v20 }
  0x88   : > { %2218 = vmatprep.subr.bf16.mxu0 %v2725_v3  ;;  %2241 = vmatpush3.bf16.msra.mxu1 %v3008_v17 }
  0x89   : > { %2242 = vmatprep.subr.bf16.mxu1 %v2725_v3 }
  0x8b   : > { %2220 = vmatpush3.bf16.msra.mxu0 %v3023_v23 }
  0x8c   : > { %2221 = vmatprep.subr.bf16.mxu0 %v2725_v3  ;;  %2244 = vmatpush3.bf16.msra.mxu1 %v3017_v20 }
  0x8d   : > { %2245 = vmatprep.subr.bf16.mxu1 %v2725_v3 }
  0x8f   : > { %2223 = vmatpush3.bf16.msra.mxu0 %v3029_v26 }
  0x90   : > { %2224 = vmatprep.subr.bf16.mxu0 %v2725_v3  ;;  %2247 = vmatpush3.bf16.msra.mxu1 %v3023_v23 }
  0x91   : > { %2248 = vmatprep.subr.bf16.mxu1 %v2725_v3 }
  0x93   : > { %2226 = vmatpush3.bf16.msra.mxu0 %v3035_v29 }
  0x94   : > { %2227 = vmatprep.subr.bf16.mxu0 %v2725_v3  ;;  %2250 = vmatpush3.bf16.msra.mxu1 %v3029_v26 }
  0x95   : > { %2251 = vmatprep.subr.bf16.mxu1 %v2725_v3 }
  0x97   : > { %2229 = vmatpush3.bf16.msra.mxu0 %v3041_v32 }
  0x98   : > { %2257 = vmatprep.subr.bf16.mxu0 %v2725_v3  ;;  %2253 = vmatpush3.bf16.msra.mxu1 %v3035_v29 }
  0x99   : > { %2254 = vmatprep.subr.bf16.mxu1 %v2725_v3 }
  0x9a   : > { %1911 = vmatmul.mubr.f32.vlgmr.msra.gmra.mrb[0].mxu0 %v333_v33 }
  0x9b   : > { %2259 = vmatpush3.bf16.msra.mxu0 %v2979_v4  ;;  %1959 = vmatprep.mubr.msk.f32.mxu0 %vm2726_vm0, %v2727_v5 }
  0x9c   : > { %2284 = vmatprep.subr.bf16.mxu0 %v2725_v3  ;;  %2256 = vmatpush3.bf16.msra.mxu1 %v3041_v32 }
  0x9d   : > { %2260 = vmatprep.subr.bf16.mxu1 %v2725_v3 }
  0x9e   : > { %1960 = vmatmul.mubr.msk.f32.vlgmr.msra.gmra.mrb[2].mxu0 %vm341_vm1, %v1681_v39 }
  0x9f   : > { %2286 = vmatpush3.bf16.msra.mxu0 %v2979_v4  ;;  %2001 = vmatprep.mubr.msk.f32.mxu0 %vm2726_vm0, %v2727_v5 }
  0xa0   : > { %2287 = vmatprep.subr.bf16.mxu0 %v2725_v3 }
  0xa2   : > { %2002 = vmatmul.mubr.msk.f32.vlgmr.msra.gmra.mrb[4].mxu0 %vm341_vm1, %v1684_v40 }
  0xa3   : > { %2289 = vmatpush3.bf16.msra.mxu0 %v2988_v9  ;;  %2036 = vmatprep.mubr.msk.f32.mxu0 %vm2726_vm0, %v2727_v5 }
  0xa4   : > { %2290 = vmatprep.subr.bf16.mxu0 %v2725_v3 }
  0xa7   : > { %2292 = vmatpush3.bf16.msra.mxu0 %v2996_v13 }
  0xa8   : > { %2293 = vmatprep.subr.bf16.mxu0 %v2725_v3 }
  0xab   : > { %2295 = vmatpush3.bf16.msra.mxu0 %v3008_v17 }
  0xac   : > { %2296 = vmatprep.subr.bf16.mxu0 %v2725_v3 }
  0xaf   : > { %2298 = vmatpush3.bf16.msra.mxu0 %v3017_v20 }
  0xb0   : > { %2299 = vmatprep.subr.bf16.mxu0 %v2725_v3 }
  0xb3   : > { %2301 = vmatpush3.bf16.msra.mxu0 %v3023_v23 }
  0xb4   : > { %2302 = vmatprep.subr.bf16.mxu0 %v2725_v3 }
  0xb7   : > { %2304 = vmatpush3.bf16.msra.mxu0 %v3029_v26 }
  0xb8   : > { %2305 = vmatprep.subr.bf16.mxu0 %v2725_v3 }
  0xbb   : > { %2307 = vmatpush3.bf16.msra.mxu0 %v3035_v29 }
  0xbc   : > { %2308 = vmatprep.subr.bf16.mxu0 %v2725_v3 }
  0xbf   : > { %2310 = vmatpush3.bf16.msra.mxu0 %v3041_v32 }
  0xc0   : > { %2314 = vmatprep.subr.bf16.mxu0 %v2725_v3 }
 0x16d   : > { %v556_v35 = vpop.f32.mrb[0].mxu0 }
 0x16e   : > { %v2416_v36 = vadd.f32 %v3059_v34, %v556_v35  ;;  %v1912_v37 = vpop.f32.mrb[1].mxu0 }
 0x170   : > { %2530 = vtanh.f32 %v2416_v36 }
 0x17a   : > { %v2531_v38 = vpop.eup %2530 }
 0x17b   : > { %561 = vst [vmem:[%s2972_s30] sm:$0xff] %v2531_v38  ;;  %1953 = vmatmul.mubr.f32.vlgmr.msra.gmra.mrb[0].mxu1 %v2531_v38 }
 0x17c   : > { %2262 = vmatpush3.bf16.msra.mxu1 %v2988_v9  ;;  %1994 = vmatprep.mubr.msk.f32.mxu1 %vm2726_vm0, %v2727_v5 }
 0x17d   : > { %2263 = vmatprep.subr.bf16.mxu1 %v2725_v3 }
 0x180   : > { %2265 = vmatpush3.bf16.msra.mxu1 %v2996_v13 }
 0x181   : > { %2266 = vmatprep.subr.bf16.mxu1 %v2725_v3 }
 0x184   : > { %2268 = vmatpush3.bf16.msra.mxu1 %v3008_v17 }
 0x185   : > { %2269 = vmatprep.subr.bf16.mxu1 %v2725_v3 }
 0x188   : > { %2271 = vmatpush3.bf16.msra.mxu1 %v3017_v20 }
 0x189   : > { %2272 = vmatprep.subr.bf16.mxu1 %v2725_v3 }
 0x18c   : > { %2274 = vmatpush3.bf16.msra.mxu1 %v3023_v23 }
 0x18d   : > { %2275 = vmatprep.subr.bf16.mxu1 %v2725_v3 }
 0x190   : > { %2277 = vmatpush3.bf16.msra.mxu1 %v3029_v26 }
 0x191   : > { %2278 = vmatprep.subr.bf16.mxu1 %v2725_v3 }
 0x194   : > { %2280 = vmatpush3.bf16.msra.mxu1 %v3035_v29 }
 0x195   : > { %2281 = vmatprep.subr.bf16.mxu1 %v2725_v3 }
 0x198   : > { %2283 = vmatpush3.bf16.msra.mxu1 %v3041_v32 }
 0x199   : > { %2311 = vmatprep.subr.bf16.mxu1 %v2725_v3 }
 0x24e   : > { %v703_v41 = vpop.f32.mrb[0].mxu1 }
 0x24f   : > { %v2417_v42 = vadd.f32 %v3059_v34, %v703_v41  ;;  %v1954_v43 = vpop.f32.mrb[1].mxu1 }
 0x251   : > { %2532 = vtanh.f32 %v2417_v42 }
 0x25b   : > { %v2533_v44 = vpop.eup %2532 }
 0x25c   : > { %1680 = vst [vmem:[%s2972_s30 + $0x8] sm:$0xff] %v2533_v44  ;;  %1995 = vmatmul.mubr.f32.vlgmr.msra.gmra.mrb[2].mxu1 %v2533_v44 }
 0x25d   : > { %2313 = vmatpush3.bf16.msra.mxu1 %v2979_v4  ;;  %2043 = vmatprep.mubr.msk.f32.mxu1 %vm2726_vm0, %v2727_v5 }
 0x25e   : > { %2338 = vmatprep.subr.bf16.mxu1 %v2725_v3 }
 0x260   : > { %2044 = vmatmul.mubr.msk.f32.vlgmr.msra.gmra.mrb[4].mxu1 %vm341_vm1, %v1687_v49 }
 0x261   : > { %2340 = vmatpush3.bf16.msra.mxu1 %v2979_v4  ;;  %2085 = vmatprep.mubr.msk.f32.mxu1 %vm2726_vm0, %v2727_v5 }
 0x262   : > { %2341 = vmatprep.subr.bf16.mxu1 %v2725_v3 }
 0x264   : > { %2086 = vmatmul.mubr.msk.f32.vlgmr.msra.gmra.mrb[6].mxu1 %vm341_vm1, %v1690_v50 }
 0x265   : > { %2343 = vmatpush3.bf16.msra.mxu1 %v2988_v9  ;;  %2120 = vmatprep.mubr.msk.f32.mxu1 %vm2726_vm0, %v2727_v5 }
 0x266   : > { %2344 = vmatprep.subr.bf16.mxu1 %v2725_v3 }
 0x269   : > { %2346 = vmatpush3.bf16.msra.mxu1 %v2996_v13 }
 0x26a   : > { %2347 = vmatprep.subr.bf16.mxu1 %v2725_v3 }
 0x26d   : > { %2349 = vmatpush3.bf16.msra.mxu1 %v3008_v17 }
 0x26e   : > { %2350 = vmatprep.subr.bf16.mxu1 %v2725_v3 }
 0x271   : > { %2352 = vmatpush3.bf16.msra.mxu1 %v3017_v20 }
 0x272   : > { %2353 = vmatprep.subr.bf16.mxu1 %v2725_v3 }
 0x275   : > { %2355 = vmatpush3.bf16.msra.mxu1 %v3023_v23 }
 0x276   : > { %2356 = vmatprep.subr.bf16.mxu1 %v2725_v3 }
 0x279   : > { %2358 = vmatpush3.bf16.msra.mxu1 %v3029_v26 }
 0x27a   : > { %2359 = vmatprep.subr.bf16.mxu1 %v2725_v3 }
 0x27d   : > { %2361 = vmatpush3.bf16.msra.mxu1 %v3035_v29 }
 0x27e   : > { %2362 = vmatprep.subr.bf16.mxu1 %v2725_v3 }
 0x281   : > { %2364 = vmatpush3.bf16.msra.mxu1 %v3041_v32 }
 0x282   : > { %2368 = vmatprep.subr.bf16.mxu1 %v2725_v3 }
 0x32f   : > { %v851_v45 = vpop.f32.mrb[2].mxu1 }
 0x330   : > { %v2418_v46 = vadd.f32 %v3059_v34, %v851_v45  ;;  %v1996_v47 = vpop.f32.mrb[3].mxu1 }
 0x332   : > { %2534 = vtanh.f32 %v2418_v46 }
 0x33c   : > { %v2535_v48 = vpop.eup %2534 }
 0x33d   : > { %1683 = vst [vmem:[%s2972_s30 + $0x10] sm:$0xff] %v2535_v48  ;;  %2037 = vmatmul.mubr.f32.vlgmr.msra.gmra.mrb[2].mxu0 %v2535_v48 }
 0x33e   : > { %2316 = vmatpush3.bf16.msra.mxu0 %v2988_v9  ;;  %2078 = vmatprep.mubr.msk.f32.mxu0 %vm2726_vm0, %v2727_v5 }
 0x33f   : > { %2317 = vmatprep.subr.bf16.mxu0 %v2725_v3 }
 0x342   : > { %2319 = vmatpush3.bf16.msra.mxu0 %v2996_v13 }
 0x343   : > { %2320 = vmatprep.subr.bf16.mxu0 %v2725_v3 }
 0x346   : > { %2322 = vmatpush3.bf16.msra.mxu0 %v3008_v17 }
 0x347   : > { %2323 = vmatprep.subr.bf16.mxu0 %v2725_v3 }
 0x34a   : > { %2325 = vmatpush3.bf16.msra.mxu0 %v3017_v20 }
 0x34b   : > { %2326 = vmatprep.subr.bf16.mxu0 %v2725_v3 }
 0x34e   : > { %2328 = vmatpush3.bf16.msra.mxu0 %v3023_v23 }
 0x34f   : > { %2329 = vmatprep.subr.bf16.mxu0 %v2725_v3 }
 0x352   : > { %2331 = vmatpush3.bf16.msra.mxu0 %v3029_v26 }
 0x353   : > { %2332 = vmatprep.subr.bf16.mxu0 %v2725_v3 }
 0x356   : > { %2334 = vmatpush3.bf16.msra.mxu0 %v3035_v29 }
 0x357   : > { %2335 = vmatprep.subr.bf16.mxu0 %v2725_v3 }
 0x35a   : > { %2337 = vmatpush3.bf16.msra.mxu0 %v3041_v32 }
 0x35b   : > { %2365 = vmatprep.subr.bf16.mxu0 %v2725_v3 }
 0x410   : > { %v999_v51 = vpop.f32.mrb[2].mxu0 }
 0x411   : > { %v2419_v52 = vadd.f32 %v3059_v34, %v999_v51  ;;  %v2038_v53 = vpop.f32.mrb[3].mxu0 }
 0x413   : > { %2536 = vtanh.f32 %v2419_v52 }
 0x41d   : > { %v2537_v54 = vpop.eup %2536 }
 0x41e   : > { %1686 = vst [vmem:[%s2972_s30 + $0x18] sm:$0xff] %v2537_v54  ;;  %2079 = vmatmul.mubr.f32.vlgmr.msra.gmra.mrb[4].mxu0 %v2537_v54 }
 0x41f   : > { %2367 = vmatpush3.bf16.msra.mxu0 %v2979_v4  ;;  %2127 = vmatprep.mubr.msk.f32.mxu0 %vm2726_vm0, %v2727_v5 }
 0x420   : > { %2392 = vmatprep.subr.bf16.mxu0 %v2725_v3 }
 0x422   : > { %2128 = vmatmul.mubr.msk.f32.vlgmr.msra.gmra.mrb[6].mxu0 %vm341_vm1, %v1693_v59 }
 0x423   : > { %2394 = vmatpush3.bf16.msra.mxu0 %v2988_v9  ;;  %2197 = vmatprep.mubr.msk.f32.mxu0 %vm2726_vm0, %v2727_v5 }
 0x424   : > { %2395 = vmatprep.subr.bf16.mxu0 %v2725_v3 }
 0x427   : > { %2397 = vmatpush3.bf16.msra.mxu0 %v2996_v13 }
 0x428   : > { %2398 = vmatprep.subr.bf16.mxu0 %v2725_v3 }
 0x42b   : > { %2400 = vmatpush3.bf16.msra.mxu0 %v3008_v17 }
 0x42c   : > { %2401 = vmatprep.subr.bf16.mxu0 %v2725_v3 }
 0x42f   : > { %2403 = vmatpush3.bf16.msra.mxu0 %v3017_v20 }
 0x430   : > { %2404 = vmatprep.subr.bf16.mxu0 %v2725_v3 }
 0x433   : > { %2406 = vmatpush3.bf16.msra.mxu0 %v3023_v23 }
 0x434   : > { %2407 = vmatprep.subr.bf16.mxu0 %v2725_v3 }
 0x437   : > { %2409 = vmatpush3.bf16.msra.mxu0 %v3029_v26 }
 0x438   : > { %2410 = vmatprep.subr.bf16.mxu0 %v2725_v3 }
 0x43b   : > { %2412 = vmatpush3.bf16.msra.mxu0 %v3035_v29 }
 0x43c   : > { %2413 = vmatprep.subr.bf16.mxu0 %v2725_v3 }
 0x43f   : > { %2415 = vmatpush3.bf16.msra.mxu0 %v3041_v32 }
 0x4f1   : > { %v1147_v55 = vpop.f32.mrb[4].mxu0 }
 0x4f2   : > { %v2420_v56 = vadd.f32 %v3059_v34, %v1147_v55  ;;  %v2080_v57 = vpop.f32.mrb[5].mxu0 }
 0x4f4   : > { %2538 = vtanh.f32 %v2420_v56 }
 0x4fe   : > { %v2539_v58 = vpop.eup %2538 }
 0x4ff   : > { %1689 = vst [vmem:[%s2972_s30 + $0x20] sm:$0xff] %v2539_v58  ;;  %2121 = vmatmul.mubr.f32.vlgmr.msra.gmra.mrb[4].mxu1 %v2539_v58 }
 0x500   : > { %2370 = vmatpush3.bf16.msra.mxu1 %v2988_v9  ;;  %2162 = vmatprep.mubr.msk.f32.mxu1 %vm2726_vm0, %v2727_v5 }
 0x501   : > { %2371 = vmatprep.subr.bf16.mxu1 %v2725_v3 }
 0x504   : > { %2373 = vmatpush3.bf16.msra.mxu1 %v2996_v13 }
 0x505   : > { %2374 = vmatprep.subr.bf16.mxu1 %v2725_v3 }
 0x508   : > { %2376 = vmatpush3.bf16.msra.mxu1 %v3008_v17 }
 0x509   : > { %2377 = vmatprep.subr.bf16.mxu1 %v2725_v3 }
 0x50c   : > { %2379 = vmatpush3.bf16.msra.mxu1 %v3017_v20 }
 0x50d   : > { %2380 = vmatprep.subr.bf16.mxu1 %v2725_v3 }
 0x510   : > { %2382 = vmatpush3.bf16.msra.mxu1 %v3023_v23 }
 0x511   : > { %2383 = vmatprep.subr.bf16.mxu1 %v2725_v3 }
 0x514   : > { %2385 = vmatpush3.bf16.msra.mxu1 %v3029_v26 }
 0x515   : > { %2386 = vmatprep.subr.bf16.mxu1 %v2725_v3 }
 0x518   : > { %2388 = vmatpush3.bf16.msra.mxu1 %v3035_v29 }
 0x519   : > { %2389 = vmatprep.subr.bf16.mxu1 %v2725_v3 }
 0x51c   : > { %2391 = vmatpush3.bf16.msra.mxu1 %v3041_v32 }
 0x5d2   : > { %v1295_v60 = vpop.f32.mrb[4].mxu1 }
 0x5d3   : > { %v2421_v61 = vadd.f32 %v3059_v34, %v1295_v60  ;;  %v2122_v62 = vpop.f32.mrb[5].mxu1 }
 0x5d5   : > { %2540 = vtanh.f32 %v2421_v61 }
 0x5df   : > { %v2541_v63 = vpop.eup %2540 }
 0x5e0   : > { %1692 = vst [vmem:[%s2972_s30 + $0x28] sm:$0xff] %v2541_v63  ;;  %2163 = vmatmul.mubr.f32.vlgmr.msra.gmra.mrb[6].mxu1 %v2541_v63 }
 0x6b3   : > { %v1443_v0 = vpop.f32.mrb[6].mxu1 }
 0x6b4   : > { %v2422_v1 = vadd.f32 %v3059_v34, %v1443_v0  ;;  %v2164_v2 = vpop.f32.mrb[7].mxu1 }
 0x6b6   : > { %2542 = vtanh.f32 %v2422_v1 }
 0x6c0   : > { %v2543_v3 = vpop.eup %2542 }
 0x6c1   : > { %1695 = vst [vmem:[%s2972_s30 + $0x30] sm:$0xff] %v2543_v3  ;;  %2198 = vmatmul.mubr.f32.vlgmr.msra.gmra.mrb[6].mxu0 %v2543_v3 }
 0x794   : > { %v1516_v4 = vpop.f32.mrb[6].mxu0 }
 0x795   : > { %v2423_v5 = vadd.f32 %v3059_v34, %v1516_v4  ;;  %v2199_v6 = vpop.f32.mrb[7].mxu0 }
 0x797   : > { %2544 = vtanh.f32 %v2423_v5 }
 0x7a1   : > { %v2545_v7 = vpop.eup %2544 }
 0x7a2   : > { %1696 = vst [vmem:[%s2972_s30 + $0x38] sm:$0xff] %v2545_v7  ;;  %1523 = vst [vmem:[#allocation2] sm:$0xff] %v2545_v7 }
 0x7a3   : > { %2645 = shalt.err (!%p2642_p0)
}
 0x7a4   : > { %s2646_s30 = scalar_lea.hbm %s3213_s7, 1024  ;;  %s2650_s26 = scalar_lea.hbm %s3270_s5, 2048 }
 0x7a5   : > { %p2647_p4 = scmp.ne.s32.totalorder %s3213_s7, %s2646_s30  ;;  %p2651_p7 = scmp.lt.u32.totalorder %s3213_s7, %s3270_s5 }
 0x7a6   : > { %p2652_p2 = scmp.lt.u32.totalorder %s2650_s26, %s2646_s30  ;;  %p2654_p12 = scmp.lt.u32.totalorder %s2646_s30, %s3213_s7 }
 0x7a7   : > { %p2648_p13 = pnand %p2647_p4, %p3287_p1 }
 0x7a8   : > { %p2653_p8 = por %p2652_p2, %p2651_p7 }
 0x7a9   : > { %p2649_p6 = pneg %p2648_p13 }
 0x7aa   : > { %p2655_p10 = por %p2654_p12, %p2653_p8 }
 0x7ac   : > { %p2656_p3 = pnand %p2655_p10, %p2649_p6 }
 0x7ae   : > { %2659 = shalt.err (!%p2656_p3)
}
 0x7af   : > { %s2729_s12 = smov 128   ;;  %s2730_s16 = smov 8  }
 0x7b0   : > { %2450 = dma.vmem_to_hbm [thread:$0]  (%p3287_p1), %s3215_s11, 1024, %s3213_s7, %s1525_s14, %s2729_s12, %s2729_s12, %s2730_s16  }
 0x7b1 PF: > { %s1554_s27 = sand.u32 1, %s2698_s18   ;;  %p3288_p5 = scmp.ne.s32.totalorder %s3279_s29, 0 }
 0x7b2   : > { %p3289_p9 = scmp.ge.s32.totalorder %s2718_s23, 2  ;;  %s1555_s21 = scalar_lea.sflag [#allocation5], %s1554_s27 }
 0x7b4   : > { %p2464_p11 = pnand %p3289_p9, %p3288_p5 }
 0x7b6   : > { %2693 = dma.done.wait (!%p2464_p11), %s1555_s21, 1024  }
 0x7b7   : > { %2695 = vsyncadd (!%p2464_p11), %s1555_s21, 4294966272  ;;  %s22_s23 = sadd.s32 1, %s2718_s23   ;;  %s3290_s18 = smov %s2702_s19 }
 0x7b8   : > { %p19_p0 = scmp.ge.s32.totalorder %s22_s23, 4   ;;  %s3291_s19 = smov %s2706_s20 }
 0x7b9   : > { %s3292_s20 = smov %s2909_s17  ;;  %s3293_s21 = smov %s2714_s22 }
 0x7ba   : > { %s3294_s22 = smov %s3296_s8  ;;  %21 = sbr.rel (!%p19_p0) target bundleno = 7 (0x7), region = 114 }
 0x7c1   :  { %1560 = vsyncpa [#allocation4], 1 }
 0x7c2   :  { %1562 = vsyncpa [#allocation4 + $0x1], 1 }
 0x7c3   :  { %1563 = vsyncpa [#allocation7], 1 }
 0x7c4   :  { %1564 = vsyncpa [#allocation5], 1 }
 0x7c5   :  { %1566 = vsyncpa [#allocation5 + $0x1], 1 }

</bundles_post_ra>
